<compile_context>
chip_gen: v7x
topology: tpu7x:2x2x1
jax: 0.10.0
libtpu: 0.0.40
codegen_flags: <defaults>
</compile_context>

<pallas_src>
import functools

import jax
import jax.numpy as jnp
from jax.experimental import pallas as pl
from jax.experimental.pallas import tpu as pltpu

# Layer widths of the autoencoder (encoder then decoder).
DIMS = [784, 256, 128, 64, 32, 16, 32, 64, 128, 256, 784]
NUM_LAYERS = len(DIMS) - 1  # 10


def _round_up(n, m):
    return ((n + m - 1) // m) * m


# Lane-padded widths for the *middle* layers (multiples of 128); layers 0 and 9
# use their exact shapes (784 is the full last dim of the input/output arrays).
PDIMS = [_round_up(d, 128) for d in DIMS]        # [896,256,128,...,128,256,896]
BIAS_COLS = PDIMS[-1]                            # 896 (one packed bias buffer)

# Row offsets of middle layers (1..8) inside the compact weight pack.
MID_OFFS = [0] * NUM_LAYERS
_off = 0
for _i in range(1, NUM_LAYERS - 1):
    MID_OFFS[_i] = _off
    _off += PDIMS[_i]
MID_ROWS = _off                                  # 1152 (all offsets 128-aligned)
MID_COLS = max(PDIMS[2:NUM_LAYERS])              # 256


def _autoencoder_kernel(x_ref, w0_ref, wmid_ref, w9_ref, b_ref, o_ref):
    """One batch tile through all 10 layers: relu(h @ W + b) on the MXU."""
    # Layer 0: raw (TM, 784) f32 tile, bf16 cast in-register (no wrapper pad).
    h = x_ref[...].astype(jnp.bfloat16)
    z = jnp.dot(h, w0_ref[...], preferred_element_type=jnp.float32)
    z = jnp.maximum(z + b_ref[0:1, 0:DIMS[1]], 0.0)
    h = z.astype(jnp.bfloat16)                               # (TM, 256)

    # Layers 1..8 from the compact middle pack (static, 128-row-aligned slices).
    for i in range(1, NUM_LAYERS - 1):
        in_p, out_p = PDIMS[i], PDIMS[i + 1]
        r0 = MID_OFFS[i]
        w = wmid_ref[r0:r0 + in_p, 0:out_p]                  # bf16
        z = jnp.dot(h, w, preferred_element_type=jnp.float32)
        z = jnp.maximum(z + b_ref[i:i + 1, 0:out_p], 0.0)    # bias+ReLU in f32
        h = z.astype(jnp.bfloat16)

    # Layer 9 (dec5): exact (256, 784) weights; final ReLU as in the PyTorch model.
    z = jnp.dot(h, w9_ref[...], preferred_element_type=jnp.float32)
    z = jnp.maximum(z + b_ref[NUM_LAYERS - 1:NUM_LAYERS, 0:DIMS[-1]], 0.0)
    o_ref[...] = z.astype(o_ref.dtype)                       # (TM, 784) store


@functools.partial(jax.jit, static_argnames=("tile_m_max", "out_dtype", "core_parallel"))
def autoencoder_forward(x, w0, wmid, w9, b_packed, *, tile_m_max=256,
                        out_dtype=jnp.bfloat16, core_parallel=False):
    """x: (B, 784) float32 -> (B, 784) `out_dtype` (bf16 by default)."""
    B = x.shape[0]
    # Adaptive batch tile: multiple of 16 (bf16 sublane pack), capped at tile_m_max.
    tile_m = min(_round_up(max(B, 1), 16), max(16, _round_up(tile_m_max, 16)))
    b_pad = _round_up(B, tile_m)
    x_in = x if b_pad == B else jnp.pad(x, ((0, b_pad - B), (0, 0)))

    # v7x: CORE_PARALLEL splits batch tiles across the 2 TensorCores.
    semantics = (pltpu.CORE_PARALLEL,) if core_parallel else ("parallel",)

    out = pl.pallas_call(
        _autoencoder_kernel,
        out_shape=jax.ShapeDtypeStruct((b_pad, DIMS[-1]), out_dtype),
        grid_spec=pltpu.PrefetchScalarGridSpec(
            num_scalar_prefetch=0,
            grid=(b_pad // tile_m,),
            in_specs=[
                # Activations: pipelined per batch tile (full 784 last dim).
                pl.BlockSpec((tile_m, DIMS[0]), lambda i: (i, 0)),
                # Resident weights/biases: constant index_map -> fetched once.
                pl.BlockSpec((DIMS[0], DIMS[1]), lambda i: (0, 0)),      # w0 (784,256)
                pl.BlockSpec((MID_ROWS, MID_COLS), lambda i: (0, 0)),    # middle pack
                pl.BlockSpec((DIMS[-2], DIMS[-1]), lambda i: (0, 0)),    # w9 (256,784)
                pl.BlockSpec((NUM_LAYERS, BIAS_COLS), lambda i: (0, 0)), # biases
            ],
            out_specs=pl.BlockSpec((tile_m, DIMS[-1]), lambda i: (i, 0)),
        ),
        compiler_params=pltpu.CompilerParams(
            dimension_semantics=semantics,
            # No vmem_limit_bytes: peak VMEM (weights ~2.9 MB double-buffered +
            # 2x(tile_m x 784 f32 in) + 2x(tile_m x 784 bf16 out)) is ~5.3 MB at
            # tile_m=256 / ~7.7 MB at 512 — under every generation's default.
        ),
    )(x_in, w0, wmid, w9, b_packed)
    return out if b_pad == B else out[:B]


def init_params(key):
    """PyTorch nn.Linear default init (U[-1/sqrt(in), 1/sqrt(in)]), stored as (in, out)."""
    weights, biases = [], []
    for i in range(NUM_LAYERS):
        fan_in, fan_out = DIMS[i], DIMS[i + 1]
        key, kw, kb = jax.random.split(key, 3)
        bound = 1.0 / jnp.sqrt(fan_in)
        w = jax.random.uniform(kw, (fan_in, fan_out), jnp.float32, -bound, bound)
        b = jax.random.uniform(kb, (fan_out,), jnp.float32, -bound, bound)
        weights.append(w)
        biases.append(b)
    return weights, biases


def pack_params(weights, biases):
    """Exact bf16 w0/w9, compact (1152, 256) bf16 middle pack, (10, 896) f32 biases."""
    w0 = weights[0].astype(jnp.bfloat16)                     # (784, 256)
    w9 = weights[-1].astype(jnp.bfloat16)                    # (256, 784)
    wmid = jnp.zeros((MID_ROWS, MID_COLS), jnp.bfloat16)
    for i in range(1, NUM_LAYERS - 1):
        r0 = MID_OFFS[i]
        wmid = wmid.at[r0:r0 + DIMS[i], :DIMS[i + 1]].set(weights[i].astype(jnp.bfloat16))
    b_packed = jnp.zeros((NUM_LAYERS, BIAS_COLS), jnp.float32)
    for i, b in enumerate(biases):
        b_packed = b_packed.at[i, :DIMS[i + 1]].set(b)
    return w0, wmid, w9, b_packed


def reference_forward(x, weights, biases, out_dtype=jnp.bfloat16):
    """Pure-JAX reference mirroring the kernel math (bf16 operands, f32 accumulation).
    Note: this deliberately matches the kernel's bf16 compute, which deviates from
    true f32 PyTorch semantics at the bf16 precision level (~0.4% relative)."""
    h = x.astype(jnp.bfloat16)
    for i, (w, b) in enumerate(zip(weights, biases)):
        z = jnp.dot(h, w.astype(jnp.bfloat16), preferred_element_type=jnp.float32) + b
        z = jnp.maximum(z, 0.0)
        h = z.astype(jnp.bfloat16) if i < NUM_LAYERS - 1 else z
    return h.astype(out_dtype)


if __name__ == "__main__":
    key = jax.random.PRNGKey(0)
    key, kx = jax.random.split(key)

    B = 8  # small demo batch (wrapper pads rows only up to the adaptive 16-row tile)
    x = jax.random.uniform(kx, (B, 784), jnp.float32)  # MNIST-pixel-like inputs in [0, 1)

    weights, biases = init_params(key)
    w0, wmid, w9, b_packed = pack_params(weights, biases)

    out = autoencoder_forward(x, w0, wmid, w9, b_packed)   # bf16 output by default
    out = jax.block_until_ready(out)

    ref = reference_forward(x, weights, biases)
    assert out.shape == (B, 784), out.shape
    assert out.dtype == jnp.bfloat16, out.dtype
    assert jnp.allclose(out.astype(jnp.float32), ref.astype(jnp.float32),
                        atol=2e-2, rtol=2e-2), "mismatch vs pure-JAX reference"

    print("KERNEL_OK")
</pallas_src>

<mosaic_0001>
module attributes {stable_mosaic.version = 11 : i64} {
  func.func @_autoencoder_kernel(%arg0: i32, %arg1: memref<16x784xf32, #tpu.memory_space<vmem>>, %arg2: memref<784x256xbf16, #tpu.memory_space<vmem>>, %arg3: memref<1152x256xbf16, #tpu.memory_space<vmem>>, %arg4: memref<256x784xbf16, #tpu.memory_space<vmem>>, %arg5: memref<10x896xf32, #tpu.memory_space<vmem>>, %arg6: memref<16x784xbf16, #tpu.memory_space<vmem>>) attributes {dimension_semantics = [#tpu.dimension_semantics<parallel>], iteration_bounds = array<i64: 1>, scalar_prefetch = 0 : i64, scratch_operands = 0 : i64, tpu.core_type = #tpu.core_type<tc>, window_params = [{transform_indices = @transform_0, window_bounds = array<i64: 16, 784>}, {pipeline_mode = #tpu.pipeline_mode<synchronous>, transform_indices = @transform_1, window_bounds = array<i64: 784, 256>}, {pipeline_mode = #tpu.pipeline_mode<synchronous>, transform_indices = @transform_2, window_bounds = array<i64: 1152, 256>}, {pipeline_mode = #tpu.pipeline_mode<synchronous>, transform_indices = @transform_3, window_bounds = array<i64: 256, 784>}, {pipeline_mode = #tpu.pipeline_mode<synchronous>, transform_indices = @transform_4, window_bounds = array<i64: 10, 896>}, {transform_indices = @transform_5, window_bounds = array<i64: 16, 784>}]} {
    %c0 = arith.constant 0 : index
    %c0_0 = arith.constant 0 : index
    %0 = vector.load %arg1[%c0, %c0_0] : memref<16x784xf32, #tpu.memory_space<vmem>>, vector<16x784xf32>
    %1 = arith.truncf %0 : vector<16x784xf32> to vector<16x784xbf16>
    %c0_1 = arith.constant 0 : index
    %c0_2 = arith.constant 0 : index
    %2 = vector.load %arg2[%c0_1, %c0_2] : memref<784x256xbf16, #tpu.memory_space<vmem>>, vector<784x256xbf16>
    %cst = arith.constant dense<0.000000e+00> : vector<16x256xf32>
    %3 = tpu.matmul %1, %2, %cst {dimension_numbers = #tpu.dot_dimension_numbers<[1], [0], [0], [1], [0, 0, 1, 1], [], []>} : vector<16x784xbf16>, vector<784x256xbf16>, vector<16x256xf32> -> vector<16x256xf32>
    %c0_3 = arith.constant 0 : index
    %c0_4 = arith.constant 0 : index
    %4 = vector.load %arg5[%c0_3, %c0_4] : memref<10x896xf32, #tpu.memory_space<vmem>>, vector<1x256xf32>
    %5 = vector.broadcast %4 : vector<1x256xf32> to vector<16x256xf32>
    %6 = arith.addf %3, %5 : vector<16x256xf32>
    %cst_5 = arith.constant 0.000000e+00 : f32
    %7 = vector.broadcast %cst_5 : f32 to vector<16x256xf32>
    %8 = arith.maximumf %6, %7 : vector<16x256xf32>
    %9 = arith.truncf %8 : vector<16x256xf32> to vector<16x256xbf16>
    %c0_6 = arith.constant 0 : index
    %c0_7 = arith.constant 0 : index
    %10 = vector.load %arg3[%c0_6, %c0_7] : memref<1152x256xbf16, #tpu.memory_space<vmem>>, vector<256x128xbf16>
    %cst_8 = arith.constant dense<0.000000e+00> : vector<16x128xf32>
    %11 = tpu.matmul %9, %10, %cst_8 {dimension_numbers = #tpu.dot_dimension_numbers<[1], [0], [0], [1], [0, 0, 1, 1], [], []>} : vector<16x256xbf16>, vector<256x128xbf16>, vector<16x128xf32> -> vector<16x128xf32>
    %c1 = arith.constant 1 : index
    %c0_9 = arith.constant 0 : index
    %12 = vector.load %arg5[%c1, %c0_9] : memref<10x896xf32, #tpu.memory_space<vmem>>, vector<1x128xf32>
    %13 = vector.broadcast %12 : vector<1x128xf32> to vector<16x128xf32>
    %14 = arith.addf %11, %13 : vector<16x128xf32>
    %cst_10 = arith.constant 0.000000e+00 : f32
    %15 = vector.broadcast %cst_10 : f32 to vector<16x128xf32>
    %16 = arith.maximumf %14, %15 : vector<16x128xf32>
    %17 = arith.truncf %16 : vector<16x128xf32> to vector<16x128xbf16>
    %c256 = arith.constant 256 : index
    %c0_11 = arith.constant 0 : index
    %18 = vector.load %arg3[%c256, %c0_11] : memref<1152x256xbf16, #tpu.memory_space<vmem>>, vector<128x128xbf16>
    %cst_12 = arith.constant dense<0.000000e+00> : vector<16x128xf32>
    %19 = tpu.matmul %17, %18, %cst_12 {dimension_numbers = #tpu.dot_dimension_numbers<[1], [0], [0], [1], [0, 0, 1, 1], [], []>} : vector<16x128xbf16>, vector<128x128xbf16>, vector<16x128xf32> -> vector<16x128xf32>
    %c2 = arith.constant 2 : index
    %c0_13 = arith.constant 0 : index
    %20 = vector.load %arg5[%c2, %c0_13] : memref<10x896xf32, #tpu.memory_space<vmem>>, vector<1x128xf32>
    %21 = vector.broadcast %20 : vector<1x128xf32> to vector<16x128xf32>
    %22 = arith.addf %19, %21 : vector<16x128xf32>
    %cst_14 = arith.constant 0.000000e+00 : f32
    %23 = vector.broadcast %cst_14 : f32 to vector<16x128xf32>
    %24 = arith.maximumf %22, %23 : vector<16x128xf32>
    %25 = arith.truncf %24 : vector<16x128xf32> to vector<16x128xbf16>
    %c384 = arith.constant 384 : index
    %c0_15 = arith.constant 0 : index
    %26 = vector.load %arg3[%c384, %c0_15] : memref<1152x256xbf16, #tpu.memory_space<vmem>>, vector<128x128xbf16>
    %cst_16 = arith.constant dense<0.000000e+00> : vector<16x128xf32>
    %27 = tpu.matmul %25, %26, %cst_16 {dimension_numbers = #tpu.dot_dimension_numbers<[1], [0], [0], [1], [0, 0, 1, 1], [], []>} : vector<16x128xbf16>, vector<128x128xbf16>, vector<16x128xf32> -> vector<16x128xf32>
    %c3 = arith.constant 3 : index
    %c0_17 = arith.constant 0 : index
    %28 = vector.load %arg5[%c3, %c0_17] : memref<10x896xf32, #tpu.memory_space<vmem>>, vector<1x128xf32>
    %29 = vector.broadcast %28 : vector<1x128xf32> to vector<16x128xf32>
    %30 = arith.addf %27, %29 : vector<16x128xf32>
    %cst_18 = arith.constant 0.000000e+00 : f32
    %31 = vector.broadcast %cst_18 : f32 to vector<16x128xf32>
    %32 = arith.maximumf %30, %31 : vector<16x128xf32>
    %33 = arith.truncf %32 : vector<16x128xf32> to vector<16x128xbf16>
    %c512 = arith.constant 512 : index
    %c0_19 = arith.constant 0 : index
    %34 = vector.load %arg3[%c512, %c0_19] : memref<1152x256xbf16, #tpu.memory_space<vmem>>, vector<128x128xbf16>
    %cst_20 = arith.constant dense<0.000000e+00> : vector<16x128xf32>
    %35 = tpu.matmul %33, %34, %cst_20 {dimension_numbers = #tpu.dot_dimension_numbers<[1], [0], [0], [1], [0, 0, 1, 1], [], []>} : vector<16x128xbf16>, vector<128x128xbf16>, vector<16x128xf32> -> vector<16x128xf32>
    %c4 = arith.constant 4 : index
    %c0_21 = arith.constant 0 : index
    %36 = vector.load %arg5[%c4, %c0_21] : memref<10x896xf32, #tpu.memory_space<vmem>>, vector<1x128xf32>
    %37 = vector.broadcast %36 : vector<1x128xf32> to vector<16x128xf32>
    %38 = arith.addf %35, %37 : vector<16x128xf32>
    %cst_22 = arith.constant 0.000000e+00 : f32
    %39 = vector.broadcast %cst_22 : f32 to vector<16x128xf32>
    %40 = arith.maximumf %38, %39 : vector<16x128xf32>
    %41 = arith.truncf %40 : vector<16x128xf32> to vector<16x128xbf16>
    %c640 = arith.constant 640 : index
    %c0_23 = arith.constant 0 : index
    %42 = vector.load %arg3[%c640, %c0_23] : memref<1152x256xbf16, #tpu.memory_space<vmem>>, vector<128x128xbf16>
    %cst_24 = arith.constant dense<0.000000e+00> : vector<16x128xf32>
    %43 = tpu.matmul %41, %42, %cst_24 {dimension_numbers = #tpu.dot_dimension_numbers<[1], [0], [0], [1], [0, 0, 1, 1], [], []>} : vector<16x128xbf16>, vector<128x128xbf16>, vector<16x128xf32> -> vector<16x128xf32>
    %c5 = arith.constant 5 : index
    %c0_25 = arith.constant 0 : index
    %44 = vector.load %arg5[%c5, %c0_25] : memref<10x896xf32, #tpu.memory_space<vmem>>, vector<1x128xf32>
    %45 = vector.broadcast %44 : vector<1x128xf32> to vector<16x128xf32>
    %46 = arith.addf %43, %45 : vector<16x128xf32>
    %cst_26 = arith.constant 0.000000e+00 : f32
    %47 = vector.broadcast %cst_26 : f32 to vector<16x128xf32>
    %48 = arith.maximumf %46, %47 : vector<16x128xf32>
    %49 = arith.truncf %48 : vector<16x128xf32> to vector<16x128xbf16>
    %c768 = arith.constant 768 : index
    %c0_27 = arith.constant 0 : index
    %50 = vector.load %arg3[%c768, %c0_27] : memref<1152x256xbf16, #tpu.memory_space<vmem>>, vector<128x128xbf16>
    %cst_28 = arith.constant dense<0.000000e+00> : vector<16x128xf32>
    %51 = tpu.matmul %49, %50, %cst_28 {dimension_numbers = #tpu.dot_dimension_numbers<[1], [0], [0], [1], [0, 0, 1, 1], [], []>} : vector<16x128xbf16>, vector<128x128xbf16>, vector<16x128xf32> -> vector<16x128xf32>
    %c6 = arith.constant 6 : index
    %c0_29 = arith.constant 0 : index
    %52 = vector.load %arg5[%c6, %c0_29] : memref<10x896xf32, #tpu.memory_space<vmem>>, vector<1x128xf32>
    %53 = vector.broadcast %52 : vector<1x128xf32> to vector<16x128xf32>
    %54 = arith.addf %51, %53 : vector<16x128xf32>
    %cst_30 = arith.constant 0.000000e+00 : f32
    %55 = vector.broadcast %cst_30 : f32 to vector<16x128xf32>
    %56 = arith.maximumf %54, %55 : vector<16x128xf32>
    %57 = arith.truncf %56 : vector<16x128xf32> to vector<16x128xbf16>
    %c896 = arith.constant 896 : index
    %c0_31 = arith.constant 0 : index
    %58 = vector.load %arg3[%c896, %c0_31] : memref<1152x256xbf16, #tpu.memory_space<vmem>>, vector<128x128xbf16>
    %cst_32 = arith.constant dense<0.000000e+00> : vector<16x128xf32>
    %59 = tpu.matmul %57, %58, %cst_32 {dimension_numbers = #tpu.dot_dimension_numbers<[1], [0], [0], [1], [0, 0, 1, 1], [], []>} : vector<16x128xbf16>, vector<128x128xbf16>, vector<16x128xf32> -> vector<16x128xf32>
    %c7 = arith.constant 7 : index
    %c0_33 = arith.constant 0 : index
    %60 = vector.load %arg5[%c7, %c0_33] : memref<10x896xf32, #tpu.memory_space<vmem>>, vector<1x128xf32>
    %61 = vector.broadcast %60 : vector<1x128xf32> to vector<16x128xf32>
    %62 = arith.addf %59, %61 : vector<16x128xf32>
    %cst_34 = arith.constant 0.000000e+00 : f32
    %63 = vector.broadcast %cst_34 : f32 to vector<16x128xf32>
    %64 = arith.maximumf %62, %63 : vector<16x128xf32>
    %65 = arith.truncf %64 : vector<16x128xf32> to vector<16x128xbf16>
    %c1024 = arith.constant 1024 : index
    %c0_35 = arith.constant 0 : index
    %66 = vector.load %arg3[%c1024, %c0_35] : memref<1152x256xbf16, #tpu.memory_space<vmem>>, vector<128x256xbf16>
    %cst_36 = arith.constant dense<0.000000e+00> : vector<16x256xf32>
    %67 = tpu.matmul %65, %66, %cst_36 {dimension_numbers = #tpu.dot_dimension_numbers<[1], [0], [0], [1], [0, 0, 1, 1], [], []>} : vector<16x128xbf16>, vector<128x256xbf16>, vector<16x256xf32> -> vector<16x256xf32>
    %c8 = arith.constant 8 : index
    %c0_37 = arith.constant 0 : index
    %68 = vector.load %arg5[%c8, %c0_37] : memref<10x896xf32, #tpu.memory_space<vmem>>, vector<1x256xf32>
    %69 = vector.broadcast %68 : vector<1x256xf32> to vector<16x256xf32>
    %70 = arith.addf %67, %69 : vector<16x256xf32>
    %cst_38 = arith.constant 0.000000e+00 : f32
    %71 = vector.broadcast %cst_38 : f32 to vector<16x256xf32>
    %72 = arith.maximumf %70, %71 : vector<16x256xf32>
    %73 = arith.truncf %72 : vector<16x256xf32> to vector<16x256xbf16>
    %c0_39 = arith.constant 0 : index
    %c0_40 = arith.constant 0 : index
    %74 = vector.load %arg4[%c0_39, %c0_40] : memref<256x784xbf16, #tpu.memory_space<vmem>>, vector<256x784xbf16>
    %cst_41 = arith.constant dense<0.000000e+00> : vector<16x784xf32>
    %75 = tpu.matmul %73, %74, %cst_41 {dimension_numbers = #tpu.dot_dimension_numbers<[1], [0], [0], [1], [0, 0, 1, 1], [], []>} : vector<16x256xbf16>, vector<256x784xbf16>, vector<16x784xf32> -> vector<16x784xf32>
    %c9 = arith.constant 9 : index
    %c0_42 = arith.constant 0 : index
    %76 = vector.load %arg5[%c9, %c0_42] : memref<10x896xf32, #tpu.memory_space<vmem>>, vector<1x784xf32>
    %77 = vector.broadcast %76 : vector<1x784xf32> to vector<16x784xf32>
    %78 = arith.addf %75, %77 : vector<16x784xf32>
    %cst_43 = arith.constant 0.000000e+00 : f32
    %79 = vector.broadcast %cst_43 : f32 to vector<16x784xf32>
    %80 = arith.maximumf %78, %79 : vector<16x784xf32>
    %81 = arith.truncf %80 : vector<16x784xf32> to vector<16x784xbf16>
    %c0_44 = arith.constant 0 : index
    %c0_45 = arith.constant 0 : index
    %82 = vector.load %arg6[%c0_44, %c0_45] : memref<16x784xbf16, #tpu.memory_space<vmem>>, vector<16x784xbf16>
    tpu.vector_store %arg6[%c0_44, %c0_45], %81 {strides = array<i32>} : memref<16x784xbf16, #tpu.memory_space<vmem>>, vector<16x784xbf16>,
    return
  }
  func.func @transform_0(%arg0: i32) -> (i32, i32) {
    %c0_i32 = arith.constant 0 : i32
    %c0_i32_0 = arith.constant 0 : i32
    return %arg0, %c0_i32 : i32, i32
  }
  func.func @transform_1(%arg0: i32) -> (i32, i32) {
    %c0_i32 = arith.constant 0 : i32
    %c0_i32_0 = arith.constant 0 : i32
    %c0_i32_1 = arith.constant 0 : i32
    return %c0_i32, %c0_i32_0 : i32, i32
  }
  func.func @transform_2(%arg0: i32) -> (i32, i32) {
    %c0_i32 = arith.constant 0 : i32
    %c0_i32_0 = arith.constant 0 : i32
    %c0_i32_1 = arith.constant 0 : i32
    return %c0_i32, %c0_i32_0 : i32, i32
  }
  func.func @transform_3(%arg0: i32) -> (i32, i32) {
    %c0_i32 = arith.constant 0 : i32
    %c0_i32_0 = arith.constant 0 : i32
    %c0_i32_1 = arith.constant 0 : i32
    return %c0_i32, %c0_i32_0 : i32, i32
  }
  func.func @transform_4(%arg0: i32) -> (i32, i32) {
    %c0_i32 = arith.constant 0 : i32
    %c0_i32_0 = arith.constant 0 : i32
    %c0_i32_1 = arith.constant 0 : i32
    return %c0_i32, %c0_i32_0 : i32, i32
  }
  func.func @transform_5(%arg0: i32) -> (i32, i32) {
    %c0_i32 = arith.constant 0 : i32
    %c0_i32_0 = arith.constant 0 : i32
    return %arg0, %c0_i32 : i32, i32
  }
}

</mosaic_0001>

<bundles_post_ra>
// kernel: autoencoder_forward.1
= control target key start
LH: loop header
LB: loop body
LE: loop exit
PB: predicated region body
PF: predicated region fallthrough
CT: control target
= control target key end

     0   :  { %10 = vsyncpa [#allocation3], 0  ;;  %s3778_s18 = smov [#allocation2]   ;;  %s4586_s0 = inlined_call_operand.vmem [shape: f32[16,784], index: 0, kind: input, shape index: {}]   ;;  %s4587_s1 = inlined_call_operand.hbm [shape: bf16[784,256], index: 1, kind: input, shape index: {}]   ;;  %s4588_s2 = inlined_call_operand.vmem [shape: bf16[1152,256], index: 2, kind: input, shape index: {}]   ;;  %s4589_s3 = inlined_call_operand.vmem [shape: bf16[256,784], index: 3, kind: input, shape index: {}]   ;;  %s4590_s4 = inlined_call_operand.vmem [shape: f32[10,896], index: 4, kind: input, shape index: {}]   ;;  %s4591_s5 = inlined_call_operand.vmem [shape: bf16[16,784], index: 5, kind: output, shape index: {}]  }
   0x1   :  { %s18_s19 = sshll.u32 %s3778_s18, 4  ;;  %s3754_s22 = scalar_lea.hbm %s4587_s1, 12544  ;;  %s19_s19 = int_to_ptr.vmem [resolvable:$true] %s18_s19 }
   0x2   :  { %p3755_p0 = scmp.ne.s32.totalorder %s4587_s1, %s3754_s22  ;;  %p3758_p1 = scmp.lt.u32.totalorder %s3754_s22, %s4587_s1 }
   0x4   :  { %p3760_p2 = pnand %p3758_p1, %p3755_p0 }
   0x6   :  { %3763 = shalt.err (!%p3760_p2)
}
   0x7   :  { %s3764_s27 = scalar_lea.vmem %s19_s19, 12544  ;;  %p3769_p4 = scmp.lt.s32.totalorder %s19_s19, %s19_s19 }
   0x8   :  { %p3765_p3 = scmp.ne.s32.totalorder %s19_s19, %s3764_s27  ;;  %p3770_p5 = scmp.lt.s32.totalorder %s3764_s27, %s3764_s27 }
   0xa   :  { %p3771_p6 = por %p3770_p5, %p3769_p4 }
   0xc   :  { %p3772_p7 = pnand %p3771_p6, %p3765_p3 }
   0xe   :  { %3775 = shalt.err (!%p3772_p7)
}
   0xf   :  { %s3779_s28 = smov 128   ;;  %s3780_s29 = smov 8  }
  0x10   :  { %24 = dma.hbm_to_vmem [thread:$0]  %s4587_s1, 12544, %s19_s19, [#allocation3], %s3779_s28, %s3779_s28, %s3780_s29  }
  0x11   :  { %3776 = dma.done.wait [#allocation3], 12544  }
  0x12   :  { %3777 = vsyncadd [#allocation3], 4294954752  ;;  %v3359_v0 = vld [vmem:[#allocation2 + $0x4] ss:$8 sps:$4 sm:$0xff]   ;;  %v3361_v1 = vld [vmem:[#allocation2] ss:$8 sps:$4 sm:$0xff]  }
  0x13   :  { %660 = vmatprep.subr.bf16.mxu0 %v3359_v0  ;;  %v3362_v2 = vld [vmem:[#allocation2 + $0x14] ss:$8 sps:$4 sm:$0xff]   ;;  %v3364_v3 = vld [vmem:[#allocation2 + $0x10] ss:$8 sps:$4 sm:$0xff]   ;;  %v3365_v4 = vld [vmem:[#allocation2 + $0x24] ss:$8 sps:$4 sm:$0xff]  }
  0x14   :  { %661 = vmatpush1.bf16.msra.mxu0 %v3361_v1  ;;  %v3367_v5 = vld [vmem:[#allocation2 + $0x20] ss:$8 sps:$4 sm:$0xff]   ;;  %v3368_v6 = vld [vmem:[#allocation2 + $0x34] ss:$8 sps:$4 sm:$0xff]   ;;  %v3370_v7 = vld [vmem:[#allocation2 + $0x30] ss:$8 sps:$4 sm:$0xff]  }
  0x15   :  { %662 = vmatprep.subr.bf16.mxu0 %v3362_v2  ;;  %v3371_v8 = vld [vmem:[#allocation2 + $0x44] ss:$8 sps:$4 sm:$0xff]   ;;  %v3373_v9 = vld [vmem:[#allocation2 + $0x40] ss:$8 sps:$4 sm:$0xff]   ;;  %v3374_v10 = vld [vmem:[#allocation2 + $0x54] ss:$8 sps:$4 sm:$0xff]  }
  0x16   :  { %v3376_v11 = vld [vmem:[#allocation2 + $0x50] ss:$8 sps:$4 sm:$0xff]   ;;  %v3377_v12 = vld [vmem:[#allocation2 + $0x64] ss:$8 sps:$4 sm:$0xff]   ;;  %v3379_v16 = vld [vmem:[#allocation2 + $0x60] ss:$8 sps:$4 sm:$0xff]  }
  0x17   :  { %v36_v13 = vld [vmem:[%s4586_s0 + $0x8] sm:$0xff]  ;;  %v43_v14 = vld [vmem:[%s4586_s0 + $0x40] sm:$0xff]  ;;  %v3383_v19 = vld [vmem:[#allocation2 + $0x84] ss:$8 sps:$4 sm:$0xff]   ;;  %vm656_vm0 = vcmask 130048   ;;  %vm3783_vm1 = vmmov 0  }
  0x18   :  { %663 = vmatpush1.bf16.msra.mxu0 %v3364_v3  ;;  %v50_v15 = vpack.c.bf16 %v43_v14, %v36_v13  ;;  %v3380_v17 = vld [vmem:[#allocation2 + $0x74] ss:$8 sps:$4 sm:$0xff]   ;;  %v3382_v18 = vld [vmem:[#allocation2 + $0x70] ss:$8 sps:$4 sm:$0xff]   ;;  %v3385_v20 = vld [vmem:[#allocation2 + $0x80] ss:$8 sps:$4 sm:$0xff]  }
  0x19   :  { %664 = vmatprep.subr.bf16.mxu0 %v3365_v4  ;;  %v3386_v21 = vld [vmem:[#allocation2 + $0x94] ss:$8 sps:$4 sm:$0xff]   ;;  %v3388_v22 = vld [vmem:[#allocation2 + $0x90] ss:$8 sps:$4 sm:$0xff]   ;;  %v3389_v23 = vld [vmem:[#allocation2 + $0xa4] ss:$8 sps:$4 sm:$0xff]  }
  0x1a   :  { %692 = vmatprep.mubr.bf16.mxu0 %v50_v15  ;;  %v3391_v24 = vld [vmem:[#allocation2 + $0xa0] ss:$8 sps:$4 sm:$0xff]   ;;  %v3392_v25 = vld [vmem:[#allocation2 + $0xb4] ss:$8 sps:$4 sm:$0xff]   ;;  %v3394_v26 = vld [vmem:[#allocation2 + $0xb0] ss:$8 sps:$4 sm:$0xff]  }
  0x1b   :  { %v3395_v27 = vld [vmem:[#allocation2 + $0xc4] ss:$8 sps:$4 sm:$0xff]   ;;  %v3397_v28 = vld [vmem:[#allocation2 + $0xc0] ss:$8 sps:$4 sm:$0xff]   ;;  %v3398_v29 = vld [vmem:[#allocation2 + $0xd4] ss:$8 sps:$4 sm:$0xff]  }
  0x1c   :  { %665 = vmatpush1.bf16.msra.mxu0 %v3367_v5  ;;  %v3400_v30 = vld [vmem:[#allocation2 + $0xd0] ss:$8 sps:$4 sm:$0xff]   ;;  %v3401_v31 = vld [vmem:[#allocation2 + $0xe4] ss:$8 sps:$4 sm:$0xff]   ;;  %v3403_v32 = vld [vmem:[#allocation2 + $0xe0] ss:$8 sps:$4 sm:$0xff]  }
  0x1d   :  { %666 = vmatprep.subr.bf16.mxu0 %v3368_v6  ;;  %v3404_v33 = vld [vmem:[#allocation2 + $0xf4] ss:$8 sps:$4 sm:$0xff]   ;;  %v3406_v34 = vld [vmem:[#allocation2 + $0xf0] ss:$8 sps:$4 sm:$0xff]   ;;  %v3409_v35 = vld [vmem:[#allocation2 + $0x104] ss:$8 sps:$4 sm:$0xff]  }
  0x1e   :  { %v35_v36 = vld [vmem:[%s4586_s0] sm:$0xff]  ;;  %v42_v37 = vld [vmem:[%s4586_s0 + $0x38] sm:$0xff]  ;;  %v45_v39 = vld [vmem:[%s4586_s0 + $0x50] sm:$0xff]  ;;  %vm2798_vm2 = vcmask 125952  }
  0x1f   :  { %v38_v38 = vld [vmem:[%s4586_s0 + $0x18] sm:$0xff]  ;;  %v49_v40 = vpack.c.bf16 %v42_v37, %v35_v36  ;;  %v3412_v43 = vld [vmem:[#allocation2 + $0x114] ss:$8 sps:$4 sm:$0xff]   ;;  %v3410_v44 = vld [vmem:[#allocation2 + $0x110] ss:$8 sps:$4 sm:$0xff]  }
  0x20   :  { %667 = vmatpush1.bf16.msra.mxu0 %v3370_v7  ;;  %v3407_v41 = vld [vmem:[#allocation2 + $0x100] ss:$8 sps:$4 sm:$0xff]   ;;  %v52_v42 = vpack.c.bf16 %v45_v39, %v38_v38  ;;  %v3415_v45 = vld [vmem:[#allocation2 + $0x124] ss:$8 sps:$4 sm:$0xff]   ;;  %v3418_v47 = vld [vmem:[#allocation2 + $0x134] ss:$8 sps:$4 sm:$0xff]  }
  0x21   :  { %668 = vmatprep.subr.bf16.mxu0 %v3371_v8  ;;  %v3413_v46 = vld [vmem:[#allocation2 + $0x120] ss:$8 sps:$4 sm:$0xff]   ;;  %v3416_v48 = vld [vmem:[#allocation2 + $0x130] ss:$8 sps:$4 sm:$0xff]   ;;  %v3421_v49 = vld [vmem:[#allocation2 + $0x144] ss:$8 sps:$4 sm:$0xff]  }
  0x22   :  { %v3506_v50 = vld [vmem:[%s4588_s2 + $0x80] ss:$8 sps:$4 sm:$0xff]   ;;  %v3508_v52 = vld [vmem:[%s4588_s2 + $0x90] ss:$8 sps:$4 sm:$0xff]   ;;  %v3424_v54 = vld [vmem:[#allocation2 + $0x154] ss:$8 sps:$4 sm:$0xff]  }
  0x23   :  { %v3507_v51 = vld [vmem:[%s4588_s2] ss:$8 sps:$4 sm:$0xff]   ;;  %v3419_v53 = vld [vmem:[#allocation2 + $0x140] ss:$8 sps:$4 sm:$0xff]   ;;  %3119 = vmatprep.subr.bf16.mxu1 %v3506_v50  ;;  %v3427_v57 = vld [vmem:[#allocation2 + $0x164] ss:$8 sps:$4 sm:$0xff]  }
  0x24   :  { %669 = vmatpush1.bf16.msra.mxu0 %v3373_v9  ;;  %v3422_v55 = vld [vmem:[#allocation2 + $0x150] ss:$8 sps:$4 sm:$0xff]   ;;  %3120 = vmatpush3.bf16.msra.mxu1 %v3507_v51  ;;  %v3509_v56 = vld [vmem:[%s4588_s2 + $0x10] ss:$8 sps:$4 sm:$0xff]   ;;  %v3430_v62 = vld [vmem:[#allocation2 + $0x174] ss:$8 sps:$4 sm:$0xff]  }
  0x25   :  { %670 = vmatprep.subr.bf16.mxu0 %v3374_v10  ;;  %3121 = vmatprep.subr.bf16.mxu1 %v3508_v52  ;;  %v3510_v58 = vld [vmem:[%s4588_s2 + $0xa0] ss:$8 sps:$4 sm:$0xff]   ;;  %v3512_v60 = vld [vmem:[%s4588_s2 + $0xb0] ss:$8 sps:$4 sm:$0xff]   ;;  %v3433_v2 = vld [vmem:[#allocation2 + $0x184] ss:$8 sps:$4 sm:$0xff]  }
  0x26   :  { %v3511_v59 = vld [vmem:[%s4588_s2 + $0x20] ss:$8 sps:$4 sm:$0xff]   ;;  %v3425_v61 = vld [vmem:[#allocation2 + $0x160] ss:$8 sps:$4 sm:$0xff]   ;;  %v3436_v6 = vld [vmem:[#allocation2 + $0x194] ss:$8 sps:$4 sm:$0xff]  }
  0x27   :  { %v3513_v63 = vld [vmem:[%s4588_s2 + $0x30] ss:$8 sps:$4 sm:$0xff]   ;;  %v3514_v0 = vld [vmem:[%s4588_s2 + $0xc0] ss:$8 sps:$4 sm:$0xff]   ;;  %v3439_v8 = vld [vmem:[#allocation2 + $0x1a4] ss:$8 sps:$4 sm:$0xff]  }
  0x28   :  { %671 = vmatpush1.bf16.msra.mxu0 %v3376_v11  ;;  %3122 = vmatpush3.bf16.msra.mxu1 %v3509_v56  ;;  %v3428_v1 = vld [vmem:[#allocation2 + $0x170] ss:$8 sps:$4 sm:$0xff]   ;;  %v3516_v4 = vld [vmem:[%s4588_s2 + $0xd0] ss:$8 sps:$4 sm:$0xff]   ;;  %v3442_v10 = vld [vmem:[#allocation2 + $0x1b4] ss:$8 sps:$4 sm:$0xff]  }
  0x29   :  { %672 = vmatprep.subr.bf16.mxu0 %v3377_v12  ;;  %3123 = vmatprep.subr.bf16.mxu1 %v3510_v58  ;;  %v3515_v3 = vld [vmem:[%s4588_s2 + $0x40] ss:$8 sps:$4 sm:$0xff]   ;;  %v3431_v5 = vld [vmem:[#allocation2 + $0x180] ss:$8 sps:$4 sm:$0xff]   ;;  %v3445_v12 = vld [vmem:[#allocation2 + $0x1c4] ss:$8 sps:$4 sm:$0xff]  }
  0x2a   :  { %v3434_v7 = vld [vmem:[#allocation2 + $0x190] ss:$8 sps:$4 sm:$0xff]   ;;  %v3437_v9 = vld [vmem:[#allocation2 + $0x1a0] ss:$8 sps:$4 sm:$0xff]   ;;  %v3448_v14 = vld [vmem:[#allocation2 + $0x1d4] ss:$8 sps:$4 sm:$0xff]  }
  0x2b   :  { %v3440_v11 = vld [vmem:[#allocation2 + $0x1b0] ss:$8 sps:$4 sm:$0xff]   ;;  %v3443_v13 = vld [vmem:[#allocation2 + $0x1c0] ss:$8 sps:$4 sm:$0xff]   ;;  %v3472_v36 = vld [vmem:[#allocation2 + $0x254] ss:$8 sps:$4 sm:$0xff]  }
  0x2c   :  { %673 = vmatpush1.bf16.msra.mxu0 %v3379_v16  ;;  %3124 = vmatpush3.bf16.msra.mxu1 %v3511_v59  ;;  %v3446_v15 = vld [vmem:[#allocation2 + $0x1d0] ss:$8 sps:$4 sm:$0xff]   ;;  %v3451_v16 = vld [vmem:[#allocation2 + $0x1e4] ss:$8 sps:$4 sm:$0xff]   ;;  %v3473_v39 = vld [vmem:[#allocation2 + $0x260] ss:$8 sps:$4 sm:$0xff]  }
  0x2d   :  { %674 = vmatprep.subr.bf16.mxu0 %v3380_v17  ;;  %3125 = vmatprep.subr.bf16.mxu1 %v3512_v60  ;;  %v3449_v17 = vld [vmem:[#allocation2 + $0x1e0] ss:$8 sps:$4 sm:$0xff]   ;;  %v3470_v37 = vld [vmem:[#allocation2 + $0x250] ss:$8 sps:$4 sm:$0xff]   ;;  %v3475_v38 = vld [vmem:[#allocation2 + $0x264] ss:$8 sps:$4 sm:$0xff]  }
  0x2e   :  { %v3493_v50 = vld [vmem:[#allocation2 + $0x2c4] ss:$8 sps:$4 sm:$0xff]   ;;  %v3491_v51 = vld [vmem:[#allocation2 + $0x2c0] ss:$8 sps:$4 sm:$0xff]   ;;  %v3496_v52 = vld [vmem:[#allocation2 + $0x2d4] ss:$8 sps:$4 sm:$0xff]  }
  0x2f   :  { %v3502_v56 = vld [vmem:[#allocation2 + $0x2f4] ss:$8 sps:$4 sm:$0xff]   ;;  %v46_v59 = vld [vmem:[%s4586_s0 + $0x58] sm:$0xff] }
  0x30   :  { %675 = vmatpush1.bf16.msra.mxu0 %v3382_v18  ;;  %3126 = vmatpush3.bf16.msra.mxu1 %v3513_v63  ;;  %v3454_v18 = vld [vmem:[#allocation2 + $0x1f4] ss:$8 sps:$4 sm:$0xff]   ;;  %v3505_v60 = vld [vmem:[#allocation2 + $0x304] ss:$8 sps:$4 sm:$0xff]   ;;  %v3781_v63 = vmov 0  }
  0x31   :  { %676 = vmatprep.subr.bf16.mxu0 %v3383_v19  ;;  %3127 = vmatprep.subr.bf16.mxu1 %v3514_v0  ;;  %v3452_v19 = vld [vmem:[#allocation2 + $0x1f0] ss:$8 sps:$4 sm:$0xff]   ;;  %v41_v0 = vld [vmem:[%s4586_s0 + $0x30] sm:$0xff] }
  0x32   :  { %v39_v58 = vld [vmem:[%s4586_s0 + $0x20] sm:$0xff] }
  0x34   :  { %677 = vmatpush1.bf16.msra.mxu0 %v3385_v20  ;;  %3128 = vmatpush3.bf16.msra.mxu1 %v3515_v3  ;;  %v37_v20 = vld [vmem:[%s4586_s0 + $0x10] sm:$0xff] }
  0x35   :  { %678 = vmatprep.subr.bf16.mxu0 %v3386_v21  ;;  %3129 = vmatprep.subr.bf16.mxu1 %v3516_v4  ;;  %v44_v21 = vld [vmem:[%s4586_s0 + $0x48] sm:$0xff]  ;;  %v3517_v3 = vld [vmem:[%s4588_s2 + $0x50] ss:$8 sps:$4 sm:$0xff]  }
  0x36   :  { %v3518_v4 = vld [vmem:[%s4588_s2 + $0xe0] ss:$8 sps:$4 sm:$0xff]  }
  0x38   :  { %679 = vmatpush1.bf16.msra.mxu0 %v3388_v22  ;;  %v3457_v22 = vld [vmem:[#allocation2 + $0x204] ss:$8 sps:$4 sm:$0xff]   ;;  %3130 = vmatpush3.bf16.msra.mxu1 %v3517_v3  ;;  %v3538_v3 = vld [vmem:[%s4588_s2 + $0x200] ss:$8 sps:$4 sm:$0xff]  }
  0x39   :  { %680 = vmatprep.subr.bf16.mxu0 %v3389_v23  ;;  %v40_v23 = vld [vmem:[%s4586_s0 + $0x28] sm:$0xff]  ;;  %3131 = vmatprep.subr.bf16.mxu1 %v3518_v4 }
  0x3c   :  { %681 = vmatpush1.bf16.msra.mxu0 %v3391_v24  ;;  %v47_v24 = vld [vmem:[%s4586_s0 + $0x60] sm:$0xff] }
  0x3d   :  { %682 = vmatprep.subr.bf16.mxu0 %v3392_v25  ;;  %v3455_v25 = vld [vmem:[#allocation2 + $0x200] ss:$8 sps:$4 sm:$0xff]  }
  0x40   :  { %683 = vmatpush1.bf16.msra.mxu0 %v3394_v26  ;;  %v51_v26 = vpack.c.bf16 %v44_v21, %v37_v20 }
  0x41   :  { %684 = vmatprep.subr.bf16.mxu0 %v3395_v27  ;;  %v3460_v27 = vld [vmem:[#allocation2 + $0x214] ss:$8 sps:$4 sm:$0xff]  }
  0x44   :  { %685 = vmatpush1.bf16.msra.mxu0 %v3397_v28  ;;  %v54_v28 = vpack.c.bf16 %v47_v24, %v40_v23 }
  0x45   :  { %686 = vmatprep.subr.bf16.mxu0 %v3398_v29  ;;  %v3458_v29 = vld [vmem:[#allocation2 + $0x210] ss:$8 sps:$4 sm:$0xff]  }
  0x48   :  { %687 = vmatpush1.bf16.msra.mxu0 %v3400_v30  ;;  %v3463_v30 = vld [vmem:[#allocation2 + $0x224] ss:$8 sps:$4 sm:$0xff]  }
  0x49   :  { %688 = vmatprep.subr.bf16.mxu0 %v3401_v31  ;;  %v3461_v31 = vld [vmem:[#allocation2 + $0x220] ss:$8 sps:$4 sm:$0xff]  }
  0x4c   :  { %689 = vmatpush1.bf16.msra.mxu0 %v3403_v32  ;;  %v3466_v32 = vld [vmem:[#allocation2 + $0x234] ss:$8 sps:$4 sm:$0xff]  }
  0x4d   :  { %690 = vmatprep.subr.bf16.mxu0 %v3404_v33  ;;  %v3464_v33 = vld [vmem:[#allocation2 + $0x230] ss:$8 sps:$4 sm:$0xff]  }
  0x50   :  { %691 = vmatpush1.bf16.msra.mxu0 %v3406_v34  ;;  %v3469_v34 = vld [vmem:[#allocation2 + $0x244] ss:$8 sps:$4 sm:$0xff]  }
  0x51   :  { %703 = vmatprep.subr.bf16.mxu0 %v3409_v35  ;;  %v3467_v35 = vld [vmem:[#allocation2 + $0x240] ss:$8 sps:$4 sm:$0xff]  }
  0x53   :  { %693 = vmatmul.mubr.bf16.vlgmr.msra.gmra.mrb[0].mxu0 %v49_v40  ;;  %v3478_v40 = vld [vmem:[#allocation2 + $0x274] ss:$8 sps:$4 sm:$0xff]  }
  0x54   :  { %704 = vmatpush1.bf16.msra.mxu0 %v3407_v41  ;;  %735 = vmatprep.mubr.bf16.mxu0 %v52_v42  ;;  %v3476_v41 = vld [vmem:[#allocation2 + $0x270] ss:$8 sps:$4 sm:$0xff]   ;;  %v3481_v42 = vld [vmem:[#allocation2 + $0x284] ss:$8 sps:$4 sm:$0xff]  }
  0x55   :  { %705 = vmatprep.subr.bf16.mxu0 %v3412_v43  ;;  %v3479_v43 = vld [vmem:[#allocation2 + $0x280] ss:$8 sps:$4 sm:$0xff]  }
  0x58   :  { %706 = vmatpush1.bf16.msra.mxu0 %v3410_v44  ;;  %v3484_v44 = vld [vmem:[#allocation2 + $0x294] ss:$8 sps:$4 sm:$0xff]  }
  0x59   :  { %707 = vmatprep.subr.bf16.mxu0 %v3415_v45  ;;  %v3482_v45 = vld [vmem:[#allocation2 + $0x290] ss:$8 sps:$4 sm:$0xff]  }
  0x5c   :  { %708 = vmatpush1.bf16.msra.mxu0 %v3413_v46  ;;  %v3487_v46 = vld [vmem:[#allocation2 + $0x2a4] ss:$8 sps:$4 sm:$0xff]  }
  0x5d   :  { %709 = vmatprep.subr.bf16.mxu0 %v3418_v47  ;;  %v3485_v47 = vld [vmem:[#allocation2 + $0x2a0] ss:$8 sps:$4 sm:$0xff]  }
  0x60   :  { %710 = vmatpush1.bf16.msra.mxu0 %v3416_v48  ;;  %v3490_v48 = vld [vmem:[#allocation2 + $0x2b4] ss:$8 sps:$4 sm:$0xff]  }
  0x61   :  { %711 = vmatprep.subr.bf16.mxu0 %v3421_v49  ;;  %v3488_v49 = vld [vmem:[#allocation2 + $0x2b0] ss:$8 sps:$4 sm:$0xff]  }
  0x64   :  { %712 = vmatpush1.bf16.msra.mxu0 %v3419_v53  ;;  %v3494_v53 = vld [vmem:[#allocation2 + $0x2d0] ss:$8 sps:$4 sm:$0xff]  }
  0x65   :  { %713 = vmatprep.subr.bf16.mxu0 %v3424_v54  ;;  %v3499_v54 = vld [vmem:[#allocation2 + $0x2e4] ss:$8 sps:$4 sm:$0xff]  }
  0x68   :  { %714 = vmatpush1.bf16.msra.mxu0 %v3422_v55  ;;  %v3497_v55 = vld [vmem:[#allocation2 + $0x2e0] ss:$8 sps:$4 sm:$0xff]  }
  0x69   :  { %715 = vmatprep.subr.bf16.mxu0 %v3427_v57  ;;  %v3500_v57 = vld [vmem:[#allocation2 + $0x2f0] ss:$8 sps:$4 sm:$0xff]  }
  0x6c   :  { %716 = vmatpush1.bf16.msra.mxu0 %v3425_v61  ;;  %v53_v61 = vpack.c.bf16 %v46_v59, %v39_v58  ;;  %v1027_v58 = vld [vmem:[%s4590_s4 + $0x2] ss:$0 sm:$0xff] }
  0x6d   :  { %717 = vmatprep.subr.bf16.mxu0 %v3430_v62  ;;  %v3503_v62 = vld [vmem:[#allocation2 + $0x300] ss:$8 sps:$4 sm:$0xff]  }
  0x70   :  { %718 = vmatpush1.bf16.msra.mxu0 %v3428_v1  ;;  %v48_v1 = vld [vmem:[%s4586_s0 + $0x68] sm:$0xff] }
  0x71   :  { %719 = vmatprep.subr.bf16.mxu0 %v3433_v2  ;;  %v55_v2 = vpack.c.bf16 %v48_v1, %v41_v0 }
  0x74   :  { %720 = vmatpush1.bf16.msra.mxu0 %v3431_v5  ;;  %v3519_v5 = vld [vmem:[%s4588_s2 + $0x60] ss:$8 sps:$4 sm:$0xff]  }
  0x75   :  { %721 = vmatprep.subr.bf16.mxu0 %v3436_v6  ;;  %3132 = vmatpush3.bf16.msra.mxu1 %v3519_v5  ;;  %v3520_v6 = vld [vmem:[%s4588_s2 + $0xf0] ss:$8 sps:$4 sm:$0xff]  }
  0x76   :  { %3133 = vmatprep.subr.bf16.mxu1 %v3520_v6  ;;  %v3539_v5 = vld [vmem:[%s4588_s2 + $0x210] ss:$8 sps:$4 sm:$0xff]   ;;  %v3540_v6 = vld [vmem:[%s4588_s2 + $0x220] ss:$8 sps:$4 sm:$0xff]  }
  0x78   :  { %722 = vmatpush1.bf16.msra.mxu0 %v3434_v7  ;;  %v3521_v7 = vld [vmem:[%s4588_s2 + $0x70] ss:$8 sps:$4 sm:$0xff]  }
  0x79   :  { %723 = vmatprep.subr.bf16.mxu0 %v3439_v8  ;;  %3134 = vmatpush3.bf16.msra.mxu1 %v3521_v7  ;;  %v3782_v8 = vmov 0.0   ;;  %v3541_v7 = vld [vmem:[%s4588_s2 + $0x230] ss:$8 sps:$4 sm:$0xff]  }
  0x7a   :  { %3217 = vmatprep.subr.bf16.mxu1 %v3782_v8 }
  0x7c   :  { %724 = vmatpush1.bf16.msra.mxu0 %v3437_v9  ;;  %v156_v9 = vlaneseq }
  0x7d   :  { %725 = vmatprep.subr.bf16.mxu0 %v3442_v10 }
  0x7e   :  { %v3917_v10 = vshrl.u32 %v156_v9, 7  ;;  %v3542_v9 = vld [vmem:[%s4588_s2 + $0x240] ss:$8 sps:$4 sm:$0xff]  }
  0x80   :  { %726 = vmatpush1.bf16.msra.mxu0 %v3440_v11  ;;  %v3920_v11 = vsub.s32 0, %v3917_v10 }
  0x81   :  { %727 = vmatprep.subr.bf16.mxu0 %v3445_v12  ;;  %v154_v12 = vld [vmem:[%s4590_s4] ss:$8 sm:$0x3] }
  0x84   :  { %728 = vmatpush1.bf16.msra.mxu0 %v3443_v13  ;;  %v3926_v13 = vsub.s32 1, %v3917_v10 }
  0x85   :  { %729 = vmatprep.subr.bf16.mxu0 %v3448_v14  ;;  %v159_v14 = vrot.slane %v154_v12, %v3920_v11 }
  0x88   :  { %730 = vmatpush1.bf16.msra.mxu0 %v3446_v15  ;;  %v163_v15 = vrot.slane %v154_v12, %v3926_v13  ;;  %v3543_v12 = vld [vmem:[%s4588_s2 + $0x250] ss:$8 sps:$4 sm:$0xff]  }
  0x89   :  { %731 = vmatprep.subr.bf16.mxu0 %v3451_v16 }
  0x8c   :  { %732 = vmatpush1.bf16.msra.mxu0 %v3449_v17 }
  0x8d   :  { %733 = vmatprep.subr.bf16.mxu0 %v3454_v18 }
  0x90   :  { %734 = vmatpush1.bf16.msra.mxu0 %v3452_v19 }
  0x91   :  { %746 = vmatprep.subr.bf16.mxu0 %v3457_v22 }
  0x93   :  { %736 = vmatmul.mubr.bf16.vlgmr.msra.gmra.mrb[0].mxu0 %v51_v26 }
  0x94   :  { %747 = vmatpush1.bf16.msra.mxu0 %v3455_v25  ;;  %778 = vmatprep.mubr.bf16.mxu0 %v54_v28 }
  0x95   :  { %748 = vmatprep.subr.bf16.mxu0 %v3460_v27 }
  0x98   :  { %749 = vmatpush1.bf16.msra.mxu0 %v3458_v29 }
  0x99   :  { %750 = vmatprep.subr.bf16.mxu0 %v3463_v30  ;;  %v3522_v30 = vld [vmem:[%s4588_s2 + $0x100] ss:$8 sps:$4 sm:$0xff]  }
  0x9c   :  { %751 = vmatpush1.bf16.msra.mxu0 %v3461_v31  ;;  %v3523_v31 = vld [vmem:[%s4588_s2 + $0x110] ss:$8 sps:$4 sm:$0xff]  }
  0x9d   :  { %752 = vmatprep.subr.bf16.mxu0 %v3466_v32  ;;  %v3524_v32 = vld [vmem:[%s4588_s2 + $0x120] ss:$8 sps:$4 sm:$0xff]  }
  0xa0   :  { %753 = vmatpush1.bf16.msra.mxu0 %v3464_v33  ;;  %v3525_v33 = vld [vmem:[%s4588_s2 + $0x130] ss:$8 sps:$4 sm:$0xff]  }
  0xa1   :  { %754 = vmatprep.subr.bf16.mxu0 %v3469_v34  ;;  %v3526_v34 = vld [vmem:[%s4588_s2 + $0x140] ss:$8 sps:$4 sm:$0xff]  }
  0xa4   :  { %755 = vmatpush1.bf16.msra.mxu0 %v3467_v35  ;;  %v3527_v35 = vld [vmem:[%s4588_s2 + $0x150] ss:$8 sps:$4 sm:$0xff]  }
  0xa5   :  { %756 = vmatprep.subr.bf16.mxu0 %v3472_v36  ;;  %v3528_v36 = vld [vmem:[%s4588_s2 + $0x160] ss:$8 sps:$4 sm:$0xff]  }
  0xa8   :  { %757 = vmatpush1.bf16.msra.mxu0 %v3470_v37  ;;  %v3529_v37 = vld [vmem:[%s4588_s2 + $0x170] ss:$8 sps:$4 sm:$0xff]  }
  0xa9   :  { %758 = vmatprep.subr.bf16.mxu0 %v3475_v38 }
  0xac   :  { %759 = vmatpush1.bf16.msra.mxu0 %v3473_v39  ;;  %v870_v39 = vld [vmem:[%s4590_s4 + $0x1] ss:$0 sm:$0xff] }
  0xad   :  { %760 = vmatprep.subr.bf16.mxu0 %v3478_v40 }
  0xb0   :  { %761 = vmatpush1.bf16.msra.mxu0 %v3476_v41 }
  0xb1   :  { %762 = vmatprep.subr.bf16.mxu0 %v3481_v42 }
  0xb4   :  { %763 = vmatpush1.bf16.msra.mxu0 %v3479_v43 }
  0xb5   :  { %764 = vmatprep.subr.bf16.mxu0 %v3484_v44 }
  0xb8   :  { %765 = vmatpush1.bf16.msra.mxu0 %v3482_v45 }
  0xb9   :  { %766 = vmatprep.subr.bf16.mxu0 %v3487_v46 }
  0xbc   :  { %767 = vmatpush1.bf16.msra.mxu0 %v3485_v47 }
  0xbd   :  { %768 = vmatprep.subr.bf16.mxu0 %v3490_v48 }
  0xc0   :  { %769 = vmatpush1.bf16.msra.mxu0 %v3488_v49  ;;  %v3530_v49 = vld [vmem:[%s4588_s2 + $0x180] ss:$8 sps:$4 sm:$0xff]  }
  0xc1   :  { %770 = vmatprep.subr.bf16.mxu0 %v3493_v50 }
  0xc4   :  { %771 = vmatpush1.bf16.msra.mxu0 %v3491_v51  ;;  %v3531_v51 = vld [vmem:[%s4588_s2 + $0x190] ss:$8 sps:$4 sm:$0xff]  }
  0xc5   :  { %772 = vmatprep.subr.bf16.mxu0 %v3496_v52  ;;  %v3532_v52 = vld [vmem:[%s4588_s2 + $0x1a0] ss:$8 sps:$4 sm:$0xff]  }
  0xc8   :  { %773 = vmatpush1.bf16.msra.mxu0 %v3494_v53  ;;  %v3533_v53 = vld [vmem:[%s4588_s2 + $0x1b0] ss:$8 sps:$4 sm:$0xff]  }
  0xc9   :  { %774 = vmatprep.subr.bf16.mxu0 %v3499_v54  ;;  %v3534_v54 = vld [vmem:[%s4588_s2 + $0x1c0] ss:$8 sps:$4 sm:$0xff]  }
  0xcc   :  { %775 = vmatpush1.bf16.msra.mxu0 %v3497_v55  ;;  %v3535_v55 = vld [vmem:[%s4588_s2 + $0x1d0] ss:$8 sps:$4 sm:$0xff]  }
  0xcd   :  { %776 = vmatprep.subr.bf16.mxu0 %v3502_v56  ;;  %v3536_v56 = vld [vmem:[%s4588_s2 + $0x1e0] ss:$8 sps:$4 sm:$0xff]  }
  0xd0   :  { %777 = vmatpush1.bf16.msra.mxu0 %v3500_v57  ;;  %v3537_v57 = vld [vmem:[%s4588_s2 + $0x1f0] ss:$8 sps:$4 sm:$0xff]  }
  0xd1   :  { %789 = vmatprep.subr.bf16.mxu0 %v3505_v60 }
  0xd3   :  { %779 = vmatmul.mubr.bf16.vlgmr.msra.gmra.mrb[0].mxu0 %v53_v61 }
  0xd4   :  { %790 = vmatpush1.bf16.msra.mxu0 %v3503_v62  ;;  %821 = vmatprep.mubr.bf16.mxu0 %v3781_v63 }
  0xdf   :  { %2907 = vmatmul.mubr.msk.bf16.vlgmr.msra.gmra.mrb[0].mxu0 %vm656_vm0, %v55_v2 }
  0xe0   :  { %1806 = vmatprep.mubr.bf16.mxu0 %v3781_v63 }
 0x1b2   :  { %v823_v16 = vpop.f32.mrb[0].mxu0 }
 0x1b3   :  { %v3337_v17 = vadd.f32 %v823_v16, %v159_v14  ;;  %v825_v18 = vpop.f32.mrb[1].mxu0  ;;  %v1136_v16 = vld [vmem:[%s4590_s4 + $0x3] ss:$0 sm:$0xff] }
 0x1b4   :  { %v3338_v19 = vadd.f32 %v825_v18, %v163_v15  ;;  %v827_v20 = vpop.f32.mrb[2].mxu0 }
 0x1b5   :  { %v3339_v21 = vadd.f32 %v827_v20, %v159_v14  ;;  %v829_v22 = vpop.f32.mrb[3].mxu0  ;;  %v832_v24 = vmax.f32 %v3337_v17, 0.0  ;;  %v3544_v14 = vld [vmem:[%s4588_s2 + $0x260] ss:$8 sps:$4 sm:$0xff]  }
 0x1b6   :  { %v3340_v23 = vadd.f32 %v829_v22, %v163_v15  ;;  %v833_v26 = vmax.f32 %v3338_v19, 0.0  ;;  %v3545_v15 = vld [vmem:[%s4588_s2 + $0x270] ss:$8 sps:$4 sm:$0xff]  }
 0x1b7   :  { %v834_v25 = vmax.f32 %v3339_v21, 0.0 }
 0x1b8   :  { %v835_v27 = vmax.f32 %v3340_v23, 0.0 }
 0x1b9   :  { %v836_v28 = vpack.c.bf16 %v834_v25, %v832_v24  ;;  %v3546_v25 = vld [vmem:[%s4588_s2 + $0x280] ss:$8 sps:$4 sm:$0xff]  }
 0x1ba   :  { %v837_v29 = vpack.c.bf16 %v835_v27, %v833_v26  ;;  %v3547_v27 = vld [vmem:[%s4588_s2 + $0x290] ss:$8 sps:$4 sm:$0xff]  }
 0x1bc   :  { %999 = vmatprep.mubr.bf16.mxu1 %v837_v29  ;;  %v3549_v29 = vld [vmem:[%s4588_s2 + $0x2b0] ss:$8 sps:$4 sm:$0xff]  }
 0x1bd   :  { %1000 = vmatmul.mubr.bf16.vlgmr.msra.gmra.mrb[0].mxu1 %v836_v28  ;;  %v3548_v28 = vld [vmem:[%s4588_s2 + $0x2a0] ss:$8 sps:$4 sm:$0xff]  }
 0x1be   :  { %3218 = vmatpush3.bf16.msra.mxu1 %v3522_v30  ;;  %3233 = vmatprep.mubr.msk.bf16.mxu1 %vm3783_vm1, %v3782_v8  ;;  %v3550_v30 = vld [vmem:[%s4588_s2 + $0x2c0] ss:$8 sps:$4 sm:$0xff]  }
 0x1bf   :  { %3219 = vmatprep.subr.bf16.mxu1 %v3782_v8 }
 0x1c2   :  { %3220 = vmatpush3.bf16.msra.mxu1 %v3523_v31  ;;  %v3551_v31 = vld [vmem:[%s4588_s2 + $0x2d0] ss:$8 sps:$4 sm:$0xff]  }
 0x1c3   :  { %3221 = vmatprep.subr.bf16.mxu1 %v3782_v8 }
 0x1c6   :  { %3222 = vmatpush3.bf16.msra.mxu1 %v3524_v32  ;;  %v3552_v32 = vld [vmem:[%s4588_s2 + $0x2e0] ss:$8 sps:$4 sm:$0xff]  }
 0x1c7   :  { %3223 = vmatprep.subr.bf16.mxu1 %v3782_v8 }
 0x1ca   :  { %3224 = vmatpush3.bf16.msra.mxu1 %v3525_v33  ;;  %v3553_v33 = vld [vmem:[%s4588_s2 + $0x2f0] ss:$8 sps:$4 sm:$0xff]  }
 0x1cb   :  { %3225 = vmatprep.subr.bf16.mxu1 %v3782_v8 }
 0x1ce   :  { %3226 = vmatpush3.bf16.msra.mxu1 %v3526_v34  ;;  %v1245_v34 = vld [vmem:[%s4590_s4 + $0x4] ss:$0 sm:$0xff] }
 0x1cf   :  { %3227 = vmatprep.subr.bf16.mxu1 %v3782_v8 }
 0x1d2   :  { %3228 = vmatpush3.bf16.msra.mxu1 %v3527_v35 }
 0x1d3   :  { %3229 = vmatprep.subr.bf16.mxu1 %v3782_v8 }
 0x1d6   :  { %3230 = vmatpush3.bf16.msra.mxu1 %v3528_v36 }
 0x1d7   :  { %3231 = vmatprep.subr.bf16.mxu1 %v3782_v8 }
 0x1da   :  { %3232 = vmatpush3.bf16.msra.mxu1 %v3529_v37 }
 0x1db   :  { %3237 = vmatprep.subr.bf16.mxu1 %v3782_v8 }
 0x290   :  { %v3135_v38 = vpop.f32.mrb[0].mxu1 }
 0x291   :  { %v3136_v40 = vpop.f32.mrb[1].mxu1 }
 0x292   :  { %v3137_v41 = vadd.f32 %v3136_v40, %v3135_v38  ;;  %v3138_v42 = vpop.f32.mrb[2].mxu1 }
 0x293   :  { %v3139_v43 = vpop.f32.mrb[3].mxu1 }
 0x294   :  { %v1002_v44 = vadd.f32 %v3137_v41, %v870_v39  ;;  %v3140_v45 = vadd.f32 %v3139_v43, %v3138_v42  ;;  %v3554_v43 = vld [vmem:[%s4588_s2 + $0x300] ss:$8 sps:$4 sm:$0xff]  }
 0x296   :  { %v1005_v46 = vadd.f32 %v3140_v45, %v870_v39  ;;  %v1008_v47 = vmax.f32 %v1002_v44, 0.0  ;;  %v3555_v45 = vld [vmem:[%s4588_s2 + $0x310] ss:$8 sps:$4 sm:$0xff]  }
 0x298   :  { %v1009_v48 = vmax.f32 %v1005_v46, 0.0  ;;  %v3556_v46 = vld [vmem:[%s4588_s2 + $0x320] ss:$8 sps:$4 sm:$0xff]  }
 0x29a   :  { %v1010_v50 = vpack.c.bf16 %v1009_v48, %v1008_v47  ;;  %v3557_v47 = vld [vmem:[%s4588_s2 + $0x330] ss:$8 sps:$4 sm:$0xff]   ;;  %v3558_v48 = vld [vmem:[%s4588_s2 + $0x340] ss:$8 sps:$4 sm:$0xff]  }
 0x29c   :  { %3234 = vmatmul.mubr.bf16.vlgmr.msra.gmra.mrb[4].mxu1 %v1010_v50  ;;  %v3560_v50 = vld [vmem:[%s4588_s2 + $0x360] ss:$8 sps:$4 sm:$0xff]  }
 0x29d   :  { %3238 = vmatpush3.bf16.msra.mxu1 %v3530_v49  ;;  %3253 = vmatprep.mubr.msk.bf16.mxu1 %vm3783_vm1, %v3782_v8  ;;  %v3559_v49 = vld [vmem:[%s4588_s2 + $0x350] ss:$8 sps:$4 sm:$0xff]  }
 0x29e   :  { %3239 = vmatprep.subr.bf16.mxu1 %v3782_v8 }
 0x2a1   :  { %3240 = vmatpush3.bf16.msra.mxu1 %v3531_v51  ;;  %v3561_v51 = vld [vmem:[%s4588_s2 + $0x370] ss:$8 sps:$4 sm:$0xff]  }
 0x2a2   :  { %3241 = vmatprep.subr.bf16.mxu1 %v3782_v8 }
 0x2a5   :  { %3242 = vmatpush3.bf16.msra.mxu1 %v3532_v52  ;;  %v1354_v52 = vld [vmem:[%s4590_s4 + $0x5] ss:$0 sm:$0xff] }
 0x2a6   :  { %3243 = vmatprep.subr.bf16.mxu1 %v3782_v8 }
 0x2a9   :  { %3244 = vmatpush3.bf16.msra.mxu1 %v3533_v53 }
 0x2aa   :  { %3245 = vmatprep.subr.bf16.mxu1 %v3782_v8 }
 0x2ad   :  { %3246 = vmatpush3.bf16.msra.mxu1 %v3534_v54 }
 0x2ae   :  { %3247 = vmatprep.subr.bf16.mxu1 %v3782_v8 }
 0x2b1   :  { %3248 = vmatpush3.bf16.msra.mxu1 %v3535_v55 }
 0x2b2   :  { %3249 = vmatprep.subr.bf16.mxu1 %v3782_v8 }
 0x2b5   :  { %3250 = vmatpush3.bf16.msra.mxu1 %v3536_v56 }
 0x2b6   :  { %3251 = vmatprep.subr.bf16.mxu1 %v3782_v8 }
 0x2b9   :  { %3252 = vmatpush3.bf16.msra.mxu1 %v3537_v57 }
 0x2ba   :  { %3257 = vmatprep.subr.bf16.mxu1 %v3782_v8 }
 0x36f   :  { %v1110_v59 = vpop.f32.mrb[4].mxu1 }
 0x370   :  { %v1111_v60 = vadd.f32 %v1110_v59, %v1027_v58  ;;  %v3235_v61 = vpop.f32.mrb[5].mxu1 }
 0x371   :  { %v1113_v62 = vpop.f32.mrb[6].mxu1  ;;  %v3562_v61 = vld [vmem:[%s4588_s2 + $0x380] ss:$8 sps:$4 sm:$0xff]  }
 0x372   :  { %v1114_v63 = vadd.f32 %v1113_v62, %v1027_v58  ;;  %v3236_v0 = vpop.f32.mrb[7].mxu1  ;;  %v1117_v1 = vmax.f32 %v1111_v60, 0.0 }
 0x373   :  { %v3564_v0 = vld [vmem:[%s4588_s2 + $0x3a0] ss:$8 sps:$4 sm:$0xff]  }
 0x374   :  { %v1118_v2 = vmax.f32 %v1114_v63, 0.0  ;;  %v3563_v63 = vld [vmem:[%s4588_s2 + $0x390] ss:$8 sps:$4 sm:$0xff]  }
 0x376   :  { %v1119_v4 = vpack.c.bf16 %v1118_v2, %v1117_v1  ;;  %v3565_v1 = vld [vmem:[%s4588_s2 + $0x3b0] ss:$8 sps:$4 sm:$0xff]   ;;  %v3566_v2 = vld [vmem:[%s4588_s2 + $0x3c0] ss:$8 sps:$4 sm:$0xff]  }
 0x378   :  { %3254 = vmatmul.mubr.bf16.vlgmr.msra.gmra.mrb[8].mxu1 %v1119_v4  ;;  %v3568_v4 = vld [vmem:[%s4588_s2 + $0x3e0] ss:$8 sps:$4 sm:$0xff]  }
 0x379   :  { %3258 = vmatpush3.bf16.msra.mxu1 %v3538_v3  ;;  %3273 = vmatprep.mubr.msk.bf16.mxu1 %vm3783_vm1, %v3782_v8  ;;  %v3567_v3 = vld [vmem:[%s4588_s2 + $0x3d0] ss:$8 sps:$4 sm:$0xff]  }
 0x37a   :  { %3259 = vmatprep.subr.bf16.mxu1 %v3782_v8 }
 0x37d   :  { %3260 = vmatpush3.bf16.msra.mxu1 %v3539_v5  ;;  %v3569_v5 = vld [vmem:[%s4588_s2 + $0x3f0] ss:$8 sps:$4 sm:$0xff]  }
 0x37e   :  { %3261 = vmatprep.subr.bf16.mxu1 %v3782_v8 }
 0x381   :  { %3262 = vmatpush3.bf16.msra.mxu1 %v3540_v6  ;;  %v3570_v6 = vld [vmem:[%s4588_s2 + $0x400] ss:$8 sps:$4 sm:$0xff]  }
 0x382   :  { %3263 = vmatprep.subr.bf16.mxu1 %v3782_v8 }
 0x385   :  { %3264 = vmatpush3.bf16.msra.mxu1 %v3541_v7  ;;  %v3572_v7 = vld [vmem:[%s4588_s2 + $0x404] ss:$8 sps:$4 sm:$0xff]  }
 0x386   :  { %3265 = vmatprep.subr.bf16.mxu1 %v3782_v8  ;;  %1774 = vmatprep.subr.bf16.mxu0 %v3572_v7 }
 0x387   :  { %1775 = vmatpush1.bf16.msra.mxu0 %v3570_v6 }
 0x389   :  { %3266 = vmatpush3.bf16.msra.mxu1 %v3542_v9  ;;  %v3575_v9 = vld [vmem:[%s4588_s2 + $0x414] ss:$8 sps:$4 sm:$0xff]  }
 0x38a   :  { %3267 = vmatprep.subr.bf16.mxu1 %v3782_v8  ;;  %1776 = vmatprep.subr.bf16.mxu0 %v3575_v9 }
 0x38d   :  { %3268 = vmatpush3.bf16.msra.mxu1 %v3543_v12  ;;  %v3578_v12 = vld [vmem:[%s4588_s2 + $0x424] ss:$8 sps:$4 sm:$0xff]  }
 0x38e   :  { %3269 = vmatprep.subr.bf16.mxu1 %v3782_v8 }
 0x391   :  { %3270 = vmatpush3.bf16.msra.mxu1 %v3544_v14  ;;  %v3576_v14 = vld [vmem:[%s4588_s2 + $0x420] ss:$8 sps:$4 sm:$0xff]  }
 0x392   :  { %3271 = vmatprep.subr.bf16.mxu1 %v3782_v8 }
 0x395   :  { %3272 = vmatpush3.bf16.msra.mxu1 %v3545_v15  ;;  %v3581_v15 = vld [vmem:[%s4588_s2 + $0x434] ss:$8 sps:$4 sm:$0xff]  }
 0x396   :  { %3277 = vmatprep.subr.bf16.mxu1 %v3782_v8 }
 0x44b   :  { %v1219_v17 = vpop.f32.mrb[8].mxu1 }
 0x44c   :  { %v1220_v18 = vadd.f32 %v1219_v17, %v1136_v16  ;;  %v3255_v19 = vpop.f32.mrb[9].mxu1  ;;  %v3584_v17 = vld [vmem:[%s4588_s2 + $0x444] ss:$8 sps:$4 sm:$0xff]  }
 0x44d   :  { %v1222_v20 = vpop.f32.mrb[10].mxu1  ;;  %v3587_v19 = vld [vmem:[%s4588_s2 + $0x454] ss:$8 sps:$4 sm:$0xff]  }
 0x44e   :  { %v1223_v21 = vadd.f32 %v1222_v20, %v1136_v16  ;;  %v3256_v22 = vpop.f32.mrb[11].mxu1  ;;  %v1226_v23 = vmax.f32 %v1220_v18, 0.0  ;;  %v3579_v16 = vld [vmem:[%s4588_s2 + $0x430] ss:$8 sps:$4 sm:$0xff]   ;;  %v3582_v18 = vld [vmem:[%s4588_s2 + $0x440] ss:$8 sps:$4 sm:$0xff]  }
 0x44f   :  { %v3585_v20 = vld [vmem:[%s4588_s2 + $0x450] ss:$8 sps:$4 sm:$0xff]  }
 0x450   :  { %v1227_v24 = vmax.f32 %v1223_v21, 0.0  ;;  %v1463_v21 = vld [vmem:[%s4590_s4 + $0x6] ss:$0 sm:$0xff] }
 0x452   :  { %v1228_v26 = vpack.c.bf16 %v1227_v24, %v1226_v23 }
 0x454   :  { %3274 = vmatmul.mubr.bf16.vlgmr.msra.gmra.mrb[12].mxu1 %v1228_v26 }
 0x455   :  { %3278 = vmatpush3.bf16.msra.mxu1 %v3546_v25  ;;  %3293 = vmatprep.mubr.msk.bf16.mxu1 %vm3783_vm1, %v3782_v8 }
 0x456   :  { %3279 = vmatprep.subr.bf16.mxu1 %v3782_v8 }
 0x459   :  { %3280 = vmatpush3.bf16.msra.mxu1 %v3547_v27 }
 0x45a   :  { %3281 = vmatprep.subr.bf16.mxu1 %v3782_v8 }
 0x45d   :  { %3282 = vmatpush3.bf16.msra.mxu1 %v3548_v28 }
 0x45e   :  { %3283 = vmatprep.subr.bf16.mxu1 %v3782_v8 }
 0x461   :  { %3284 = vmatpush3.bf16.msra.mxu1 %v3549_v29 }
 0x462   :  { %3285 = vmatprep.subr.bf16.mxu1 %v3782_v8 }
 0x465   :  { %3286 = vmatpush3.bf16.msra.mxu1 %v3550_v30 }
 0x466   :  { %3287 = vmatprep.subr.bf16.mxu1 %v3782_v8 }
 0x469   :  { %3288 = vmatpush3.bf16.msra.mxu1 %v3551_v31  ;;  %v3590_v31 = vld [vmem:[%s4588_s2 + $0x464] ss:$8 sps:$4 sm:$0xff]  }
 0x46a   :  { %3289 = vmatprep.subr.bf16.mxu1 %v3782_v8 }
 0x46d   :  { %3290 = vmatpush3.bf16.msra.mxu1 %v3552_v32  ;;  %v3588_v32 = vld [vmem:[%s4588_s2 + $0x460] ss:$8 sps:$4 sm:$0xff]  }
 0x46e   :  { %3291 = vmatprep.subr.bf16.mxu1 %v3782_v8 }
 0x471   :  { %3292 = vmatpush3.bf16.msra.mxu1 %v3553_v33  ;;  %v3593_v33 = vld [vmem:[%s4588_s2 + $0x474] ss:$8 sps:$4 sm:$0xff]  }
 0x472   :  { %3297 = vmatprep.subr.bf16.mxu1 %v3782_v8 }
 0x527   :  { %v1328_v35 = vpop.f32.mrb[12].mxu1 }
 0x528   :  { %v1329_v36 = vadd.f32 %v1328_v35, %v1245_v34  ;;  %v3275_v37 = vpop.f32.mrb[13].mxu1  ;;  %v3594_v35 = vld [vmem:[%s4589_s3] ss:$28 sps:$4 sm:$0xff]  }
 0x529   :  { %v1331_v38 = vpop.f32.mrb[14].mxu1  ;;  %v3599_v37 = vld [vmem:[%s4589_s3 + $0xc] ss:$28 sps:$4 sm:$0xff]  }
 0x52a   :  { %v1332_v39 = vadd.f32 %v1331_v38, %v1245_v34  ;;  %v3276_v40 = vpop.f32.mrb[15].mxu1  ;;  %v1335_v41 = vmax.f32 %v1329_v36, 0.0  ;;  %v3591_v34 = vld [vmem:[%s4588_s2 + $0x470] ss:$8 sps:$4 sm:$0xff]   ;;  %v3596_v36 = vld [vmem:[%s4589_s3 + $0x4] ss:$28 sps:$4 sm:$0xff]  }
 0x52b   :  { %v3602_v38 = vld [vmem:[%s4589_s3 + $0x3c] ss:$28 sps:$4 sm:$0xff]   ;;  %v3608_v40 = vld [vmem:[%s4589_s3 + $0x74] ss:$28 sps:$4 sm:$0xff]  }
 0x52c   :  { %v1336_v42 = vmax.f32 %v1332_v39, 0.0  ;;  %v3600_v39 = vld [vmem:[%s4589_s3 + $0x38] ss:$28 sps:$4 sm:$0xff]  }
 0x52e   :  { %v1337_v44 = vpack.c.bf16 %v1336_v42, %v1335_v41  ;;  %v3606_v41 = vld [vmem:[%s4589_s3 + $0x70] ss:$28 sps:$4 sm:$0xff]  }
 0x52f   :  { %v3614_v42 = vld [vmem:[%s4589_s3 + $0xac] ss:$28 sps:$4 sm:$0xff]  }
 0x530   :  { %3294 = vmatmul.mubr.bf16.vlgmr.msra.gmra.mrb[16].mxu1 %v1337_v44  ;;  %v3620_v44 = vld [vmem:[%s4589_s3 + $0xe4] ss:$28 sps:$4 sm:$0xff]  }
 0x531   :  { %3298 = vmatpush3.bf16.msra.mxu1 %v3554_v43  ;;  %3313 = vmatprep.mubr.msk.bf16.mxu1 %vm3783_vm1, %v3782_v8  ;;  %v3612_v43 = vld [vmem:[%s4589_s3 + $0xa8] ss:$28 sps:$4 sm:$0xff]  }
 0x532   :  { %3299 = vmatprep.subr.bf16.mxu1 %v3782_v8 }
 0x535   :  { %3300 = vmatpush3.bf16.msra.mxu1 %v3555_v45  ;;  %v3618_v45 = vld [vmem:[%s4589_s3 + $0xe0] ss:$28 sps:$4 sm:$0xff]  }
 0x536   :  { %3301 = vmatprep.subr.bf16.mxu1 %v3782_v8 }
 0x539   :  { %3302 = vmatpush3.bf16.msra.mxu1 %v3556_v46  ;;  %v3626_v46 = vld [vmem:[%s4589_s3 + $0x11c] ss:$28 sps:$4 sm:$0xff]  }
 0x53a   :  { %3303 = vmatprep.subr.bf16.mxu1 %v3782_v8 }
 0x53d   :  { %3304 = vmatpush3.bf16.msra.mxu1 %v3557_v47  ;;  %v3624_v47 = vld [vmem:[%s4589_s3 + $0x118] ss:$28 sps:$4 sm:$0xff]  }
 0x53e   :  { %3305 = vmatprep.subr.bf16.mxu1 %v3782_v8 }
 0x541   :  { %3306 = vmatpush3.bf16.msra.mxu1 %v3558_v48  ;;  %v3632_v48 = vld [vmem:[%s4589_s3 + $0x154] ss:$28 sps:$4 sm:$0xff]  }
 0x542   :  { %3307 = vmatprep.subr.bf16.mxu1 %v3782_v8 }
 0x545   :  { %3308 = vmatpush3.bf16.msra.mxu1 %v3559_v49  ;;  %v3630_v49 = vld [vmem:[%s4589_s3 + $0x150] ss:$28 sps:$4 sm:$0xff]  }
 0x546   :  { %3309 = vmatprep.subr.bf16.mxu1 %v3782_v8 }
 0x549   :  { %3310 = vmatpush3.bf16.msra.mxu1 %v3560_v50  ;;  %v3638_v50 = vld [vmem:[%s4589_s3 + $0x18c] ss:$28 sps:$4 sm:$0xff]  }
 0x54a   :  { %3311 = vmatprep.subr.bf16.mxu1 %v3782_v8 }
 0x54d   :  { %3312 = vmatpush3.bf16.msra.mxu1 %v3561_v51  ;;  %v3636_v51 = vld [vmem:[%s4589_s3 + $0x188] ss:$28 sps:$4 sm:$0xff]  }
 0x54e   :  { %3317 = vmatprep.subr.bf16.mxu1 %v3782_v8 }
 0x603   :  { %v1437_v53 = vpop.f32.mrb[16].mxu1 }
 0x604   :  { %v1438_v54 = vadd.f32 %v1437_v53, %v1354_v52  ;;  %v3295_v55 = vpop.f32.mrb[17].mxu1  ;;  %v3642_v53 = vld [vmem:[%s4589_s3 + $0x1c0] ss:$28 sps:$4 sm:$0xff]  }
 0x605   :  { %v1440_v56 = vpop.f32.mrb[18].mxu1  ;;  %v3648_v55 = vld [vmem:[%s4589_s3 + $0x1f8] ss:$28 sps:$4 sm:$0xff]  }
 0x606   :  { %v1441_v57 = vadd.f32 %v1440_v56, %v1354_v52  ;;  %v3296_v58 = vpop.f32.mrb[19].mxu1  ;;  %v1444_v59 = vmax.f32 %v1438_v54, 0.0  ;;  %v3644_v52 = vld [vmem:[%s4589_s3 + $0x1c4] ss:$28 sps:$4 sm:$0xff]   ;;  %v3650_v54 = vld [vmem:[%s4589_s3 + $0x1fc] ss:$28 sps:$4 sm:$0xff]  }
 0x607   :  { %v3656_v56 = vld [vmem:[%s4589_s3 + $0x234] ss:$28 sps:$4 sm:$0xff]   ;;  %v3662_v58 = vld [vmem:[%s4589_s3 + $0x26c] ss:$28 sps:$4 sm:$0xff]  }
 0x608   :  { %v1445_v60 = vmax.f32 %v1441_v57, 0.0  ;;  %v3654_v57 = vld [vmem:[%s4589_s3 + $0x230] ss:$28 sps:$4 sm:$0xff]  }
 0x60a   :  { %v1446_v62 = vpack.c.bf16 %v1445_v60, %v1444_v59  ;;  %v3660_v59 = vld [vmem:[%s4589_s3 + $0x268] ss:$28 sps:$4 sm:$0xff]  }
 0x60b   :  { %v3668_v60 = vld [vmem:[%s4589_s3 + $0x2a4] ss:$28 sps:$4 sm:$0xff]  }
 0x60c   :  { %3314 = vmatmul.mubr.bf16.vlgmr.msra.gmra.mrb[20].mxu1 %v1446_v62  ;;  %v3674_v62 = vld [vmem:[%s4589_s3 + $0x2dc] ss:$28 sps:$4 sm:$0xff]  }
 0x60d   :  { %3318 = vmatpush3.bf16.msra.mxu1 %v3562_v61  ;;  %3333 = vmatprep.mubr.msk.bf16.mxu1 %vm3783_vm1, %v3782_v8  ;;  %v3666_v61 = vld [vmem:[%s4589_s3 + $0x2a0] ss:$28 sps:$4 sm:$0xff]  }
 0x60e   :  { %3319 = vmatprep.subr.bf16.mxu1 %v3782_v8 }
 0x611   :  { %3320 = vmatpush3.bf16.msra.mxu1 %v3563_v63  ;;  %v3672_v63 = vld [vmem:[%s4589_s3 + $0x2d8] ss:$28 sps:$4 sm:$0xff]  }
 0x612   :  { %3321 = vmatprep.subr.bf16.mxu1 %v3782_v8 }
 0x615   :  { %3322 = vmatpush3.bf16.msra.mxu1 %v3564_v0  ;;  %v1572_v0 = vld [vmem:[%s4590_s4 + $0x7] ss:$0 sm:$0xff] }
 0x616   :  { %3323 = vmatprep.subr.bf16.mxu1 %v3782_v8 }
 0x619   :  { %3324 = vmatpush3.bf16.msra.mxu1 %v3565_v1 }
 0x61a   :  { %3325 = vmatprep.subr.bf16.mxu1 %v3782_v8 }
 0x61d   :  { %3326 = vmatpush3.bf16.msra.mxu1 %v3566_v2 }
 0x61e   :  { %3327 = vmatprep.subr.bf16.mxu1 %v3782_v8 }
 0x621   :  { %3328 = vmatpush3.bf16.msra.mxu1 %v3567_v3 }
 0x622   :  { %3329 = vmatprep.subr.bf16.mxu1 %v3782_v8 }
 0x625   :  { %3330 = vmatpush3.bf16.msra.mxu1 %v3568_v4 }
 0x626   :  { %3331 = vmatprep.subr.bf16.mxu1 %v3782_v8  ;;  %v3573_v8 = vld [vmem:[%s4588_s2 + $0x410] ss:$8 sps:$4 sm:$0xff]  }
 0x627   :  { %1777 = vmatpush1.bf16.msra.mxu0 %v3573_v8  ;;  %v3597_v8 = vld [vmem:[%s4589_s3 + $0x8] ss:$28 sps:$4 sm:$0xff]  }
 0x628   :  { %1778 = vmatprep.subr.bf16.mxu0 %v3578_v12 }
 0x629   :  { %3332 = vmatpush3.bf16.msra.mxu1 %v3569_v5 }
 0x62a   :  { %2567 = vmatprep.subr.bf16.mxu1 %v3596_v36  ;;  %v3671_v36 = vld [vmem:[%s4589_s3 + $0x2ac] ss:$28 sps:$4 sm:$0xff]  }
 0x62b   :  { %1779 = vmatpush1.bf16.msra.mxu0 %v3576_v14  ;;  %v3605_v14 = vld [vmem:[%s4589_s3 + $0x44] ss:$28 sps:$4 sm:$0xff]  }
 0x62c   :  { %1780 = vmatprep.subr.bf16.mxu0 %v3581_v15  ;;  %v3603_v15 = vld [vmem:[%s4589_s3 + $0x40] ss:$28 sps:$4 sm:$0xff]  }
 0x62f   :  { %1781 = vmatpush1.bf16.msra.mxu0 %v3579_v16  ;;  %v3611_v16 = vld [vmem:[%s4589_s3 + $0x7c] ss:$28 sps:$4 sm:$0xff]  }
 0x630   :  { %1782 = vmatprep.subr.bf16.mxu0 %v3584_v17  ;;  %v3609_v17 = vld [vmem:[%s4589_s3 + $0x78] ss:$28 sps:$4 sm:$0xff]  }
 0x633   :  { %1783 = vmatpush1.bf16.msra.mxu0 %v3582_v18  ;;  %v3617_v18 = vld [vmem:[%s4589_s3 + $0xb4] ss:$28 sps:$4 sm:$0xff]  }
 0x634   :  { %1784 = vmatprep.subr.bf16.mxu0 %v3587_v19  ;;  %v3615_v19 = vld [vmem:[%s4589_s3 + $0xb0] ss:$28 sps:$4 sm:$0xff]  }
 0x637   :  { %1785 = vmatpush1.bf16.msra.mxu0 %v3585_v20  ;;  %v3623_v20 = vld [vmem:[%s4589_s3 + $0xec] ss:$28 sps:$4 sm:$0xff]  }
 0x638   :  { %1786 = vmatprep.subr.bf16.mxu0 %v3590_v31  ;;  %v3651_v31 = vld [vmem:[%s4589_s3 + $0x200] ss:$28 sps:$4 sm:$0xff]  }
 0x63b   :  { %1787 = vmatpush1.bf16.msra.mxu0 %v3588_v32  ;;  %v3659_v32 = vld [vmem:[%s4589_s3 + $0x23c] ss:$28 sps:$4 sm:$0xff]  }
 0x63c   :  { %1788 = vmatprep.subr.bf16.mxu0 %v3593_v33  ;;  %v3657_v33 = vld [vmem:[%s4589_s3 + $0x238] ss:$28 sps:$4 sm:$0xff]  }
 0x63f   :  { %1789 = vmatpush1.bf16.msra.mxu0 %v3591_v34  ;;  %v3665_v34 = vld [vmem:[%s4589_s3 + $0x274] ss:$28 sps:$4 sm:$0xff]  }
 0x640   :  { %2610 = vmatprep.subr.bf16.mxu0 %v3599_v37  ;;  %v3669_v37 = vld [vmem:[%s4589_s3 + $0x2a8] ss:$28 sps:$4 sm:$0xff]  }
 0x6df   :  { %v1546_v22 = vpop.f32.mrb[20].mxu1 }
 0x6e0   :  { %v1547_v23 = vadd.f32 %v1546_v22, %v1463_v21  ;;  %v3315_v24 = vpop.f32.mrb[21].mxu1  ;;  %v3629_v22 = vld [vmem:[%s4589_s3 + $0x124] ss:$28 sps:$4 sm:$0xff]  }
 0x6e1   :  { %v1549_v25 = vpop.f32.mrb[22].mxu1  ;;  %v3635_v24 = vld [vmem:[%s4589_s3 + $0x15c] ss:$28 sps:$4 sm:$0xff]  }
 0x6e2   :  { %v1550_v26 = vadd.f32 %v1549_v25, %v1463_v21  ;;  %v3316_v27 = vpop.f32.mrb[23].mxu1  ;;  %v1553_v28 = vmax.f32 %v1547_v23, 0.0  ;;  %v3621_v21 = vld [vmem:[%s4589_s3 + $0xe8] ss:$28 sps:$4 sm:$0xff]   ;;  %v3627_v23 = vld [vmem:[%s4589_s3 + $0x120] ss:$28 sps:$4 sm:$0xff]  }
 0x6e3   :  { %v3633_v25 = vld [vmem:[%s4589_s3 + $0x158] ss:$28 sps:$4 sm:$0xff]   ;;  %v3639_v27 = vld [vmem:[%s4589_s3 + $0x190] ss:$28 sps:$4 sm:$0xff]  }
 0x6e4   :  { %v1554_v29 = vmax.f32 %v1550_v26, 0.0  ;;  %v3641_v26 = vld [vmem:[%s4589_s3 + $0x194] ss:$28 sps:$4 sm:$0xff]  }
 0x6e6   :  { %v1555_v30 = vpack.c.bf16 %v1554_v29, %v1553_v28  ;;  %v3647_v28 = vld [vmem:[%s4589_s3 + $0x1cc] ss:$28 sps:$4 sm:$0xff]  }
 0x6e7   :  { %v3645_v29 = vld [vmem:[%s4589_s3 + $0x1c8] ss:$28 sps:$4 sm:$0xff]  }
 0x6e8   :  { %3334 = vmatmul.mubr.bf16.vlgmr.msra.gmra.mrb[24].mxu1 %v1555_v30  ;;  %v3653_v30 = vld [vmem:[%s4589_s3 + $0x204] ss:$28 sps:$4 sm:$0xff]  }
 0x6e9   :  { %2568 = vmatpush1.bf16.msra.mxu1 %v3594_v35  ;;  %v3663_v35 = vld [vmem:[%s4589_s3 + $0x270] ss:$28 sps:$4 sm:$0xff]  }
 0x6ea   :  { %2569 = vmatprep.subr.bf16.mxu1 %v3602_v38  ;;  %v3677_v38 = vld [vmem:[%s4589_s3 + $0x2e4] ss:$28 sps:$4 sm:$0xff]  }
 0x6ed   :  { %2570 = vmatpush1.bf16.msra.mxu1 %v3600_v39  ;;  %v3675_v39 = vld [vmem:[%s4589_s3 + $0x2e0] ss:$28 sps:$4 sm:$0xff]  }
 0x6ee   :  { %2571 = vmatprep.subr.bf16.mxu1 %v3608_v40  ;;  %v3680_v40 = vld [vmem:[%s4589_s3 + $0x314] ss:$28 sps:$4 sm:$0xff]  }
 0x6f1   :  { %2572 = vmatpush1.bf16.msra.mxu1 %v3606_v41  ;;  %v3683_v41 = vld [vmem:[%s4589_s3 + $0x31c] ss:$28 sps:$4 sm:$0xff]  }
 0x6f2   :  { %2573 = vmatprep.subr.bf16.mxu1 %v3614_v42  ;;  %v3678_v42 = vld [vmem:[%s4589_s3 + $0x310] ss:$28 sps:$4 sm:$0xff]  }
 0x6f5   :  { %2574 = vmatpush1.bf16.msra.mxu1 %v3612_v43  ;;  %v3681_v43 = vld [vmem:[%s4589_s3 + $0x318] ss:$28 sps:$4 sm:$0xff]  }
 0x6f6   :  { %2575 = vmatprep.subr.bf16.mxu1 %v3620_v44  ;;  %v3686_v44 = vld [vmem:[%s4589_s3 + $0x34c] ss:$28 sps:$4 sm:$0xff]  }
 0x6f9   :  { %2576 = vmatpush1.bf16.msra.mxu1 %v3618_v45  ;;  %v3689_v45 = vld [vmem:[%s4589_s3 + $0x354] ss:$28 sps:$4 sm:$0xff]  }
 0x6fa   :  { %2577 = vmatprep.subr.bf16.mxu1 %v3626_v46  ;;  %v3684_v46 = vld [vmem:[%s4589_s3 + $0x348] ss:$28 sps:$4 sm:$0xff]  }
 0x6fd   :  { %2578 = vmatpush1.bf16.msra.mxu1 %v3624_v47  ;;  %v3687_v47 = vld [vmem:[%s4589_s3 + $0x350] ss:$28 sps:$4 sm:$0xff]  }
 0x6fe   :  { %2579 = vmatprep.subr.bf16.mxu1 %v3632_v48  ;;  %v3692_v48 = vld [vmem:[%s4589_s3 + $0x14] ss:$28 sps:$4 sm:$0xff]  }
 0x701   :  { %2580 = vmatpush1.bf16.msra.mxu1 %v3630_v49  ;;  %v3693_v49 = vld [vmem:[%s4589_s3 + $0x1d8] ss:$28 sps:$4 sm:$0xff]  }
 0x702   :  { %2581 = vmatprep.subr.bf16.mxu1 %v3638_v50  ;;  %v2972_v50 = vld [vmem:[%s4590_s4 + $0x38] ss:$8 sm:$0x3] }
 0x705   :  { %2582 = vmatpush1.bf16.msra.mxu1 %v3636_v51  ;;  %v1687_v51 = vrot.slane %v2972_v50, %v3920_v11 }
 0x706   :  { %2583 = vmatprep.subr.bf16.mxu1 %v3644_v52  ;;  %v1691_v52 = vrot.slane %v2972_v50, %v3926_v13  ;;  %v3753_v50 = vld [vmem:[%s4589_s3 + $0x35c] ss:$28 sps:$4 sm:$0xff]  }
 0x709   :  { %2584 = vmatpush1.bf16.msra.mxu1 %v3642_v53 }
 0x70a   :  { %2585 = vmatprep.subr.bf16.mxu1 %v3650_v54 }
 0x70d   :  { %2586 = vmatpush1.bf16.msra.mxu1 %v3648_v55 }
 0x70e   :  { %2587 = vmatprep.subr.bf16.mxu1 %v3656_v56 }
 0x711   :  { %2588 = vmatpush1.bf16.msra.mxu1 %v3654_v57 }
 0x712   :  { %2589 = vmatprep.subr.bf16.mxu1 %v3662_v58 }
 0x715   :  { %2590 = vmatpush1.bf16.msra.mxu1 %v3660_v59 }
 0x716   :  { %2591 = vmatprep.subr.bf16.mxu1 %v3668_v60 }
 0x719   :  { %2592 = vmatpush1.bf16.msra.mxu1 %v3666_v61 }
 0x71a   :  { %2593 = vmatprep.subr.bf16.mxu1 %v3674_v62 }
 0x71d   :  { %2594 = vmatpush1.bf16.msra.mxu1 %v3672_v63 }
 0x71e   :  { %2595 = vmatprep.subr.bf16.mxu1 %v3680_v40  ;;  %v3738_v40 = vld [vmem:[%s4589_s3 + $0x244] ss:$28 sps:$4 sm:$0xff]  }
 0x721   :  { %2596 = vmatpush1.bf16.msra.mxu1 %v3678_v42  ;;  %v3741_v42 = vld [vmem:[%s4589_s3 + $0x27c] ss:$28 sps:$4 sm:$0xff]  }
 0x722   :  { %2597 = vmatprep.subr.bf16.mxu1 %v3686_v44  ;;  %v3744_v44 = vld [vmem:[%s4589_s3 + $0x2b4] ss:$28 sps:$4 sm:$0xff]  }
 0x725   :  { %2598 = vmatpush1.bf16.msra.mxu1 %v3684_v46  ;;  %v3747_v46 = vld [vmem:[%s4589_s3 + $0x2ec] ss:$28 sps:$4 sm:$0xff]  }
 0x726   :  { %2653 = vmatprep.subr.bf16.mxu1 %v3692_v48  ;;  %v3750_v48 = vld [vmem:[%s4589_s3 + $0x324] ss:$28 sps:$4 sm:$0xff]  }
 0x7bb   :  { %v1655_v1 = vpop.f32.mrb[24].mxu1 }
 0x7bc   :  { %v1656_v2 = vadd.f32 %v1655_v1, %v1572_v0  ;;  %v3335_v3 = vpop.f32.mrb[25].mxu1 }
 0x7bd   :  { %v1658_v4 = vpop.f32.mrb[26].mxu1  ;;  %v3690_v3 = vld [vmem:[%s4589_s3 + $0x10] ss:$28 sps:$4 sm:$0xff]  }
 0x7be   :  { %v1659_v5 = vadd.f32 %v1658_v4, %v1572_v0  ;;  %v3336_v6 = vpop.f32.mrb[27].mxu1  ;;  %v1662_v7 = vmax.f32 %v1656_v2, 0.0  ;;  %v3694_v4 = vld [vmem:[%s4589_s3 + $0x18] ss:$28 sps:$4 sm:$0xff]  }
 0x7bf   :  { %v3698_v6 = vld [vmem:[%s4589_s3 + $0x210] ss:$28 sps:$4 sm:$0xff]  }
 0x7c0   :  { %v1663_v9 = vmax.f32 %v1659_v5, 0.0  ;;  %v3697_v5 = vld [vmem:[%s4589_s3 + $0x4c] ss:$28 sps:$4 sm:$0xff]  }
 0x7c2   :  { %v1664_v12 = vpack.c.bf16 %v1663_v9, %v1662_v7  ;;  %v3695_v7 = vld [vmem:[%s4589_s3 + $0x48] ss:$28 sps:$4 sm:$0xff]   ;;  %v3699_v9 = vld [vmem:[%s4589_s3 + $0x50] ss:$28 sps:$4 sm:$0xff]  }
 0x7c4   :  { %1807 = vmatmul.mubr.bf16.vlgmr.msra.gmra.mrb[4].mxu0 %v1664_v12  ;;  %v3703_v12 = vld [vmem:[%s4589_s3 + $0x248] ss:$28 sps:$4 sm:$0xff]  }
 0x7c5   :  { %2611 = vmatpush1.bf16.msra.mxu0 %v3597_v8  ;;  %v3702_v8 = vld [vmem:[%s4589_s3 + $0x84] ss:$28 sps:$4 sm:$0xff]  }
 0x7c6   :  { %2612 = vmatprep.subr.bf16.mxu0 %v3605_v14  ;;  %v3700_v14 = vld [vmem:[%s4589_s3 + $0x80] ss:$28 sps:$4 sm:$0xff]  }
 0x7c9   :  { %2613 = vmatpush1.bf16.msra.mxu0 %v3603_v15  ;;  %v3704_v15 = vld [vmem:[%s4589_s3 + $0x88] ss:$28 sps:$4 sm:$0xff]  }
 0x7ca   :  { %2614 = vmatprep.subr.bf16.mxu0 %v3611_v16  ;;  %v3707_v16 = vld [vmem:[%s4589_s3 + $0xbc] ss:$28 sps:$4 sm:$0xff]  }
 0x7cd   :  { %2615 = vmatpush1.bf16.msra.mxu0 %v3609_v17  ;;  %v3708_v17 = vld [vmem:[%s4589_s3 + $0x280] ss:$28 sps:$4 sm:$0xff]  }
 0x7ce   :  { %2616 = vmatprep.subr.bf16.mxu0 %v3617_v18  ;;  %v3705_v18 = vld [vmem:[%s4589_s3 + $0xb8] ss:$28 sps:$4 sm:$0xff]  }
 0x7d1   :  { %2617 = vmatpush1.bf16.msra.mxu0 %v3615_v19  ;;  %v3709_v19 = vld [vmem:[%s4589_s3 + $0xc0] ss:$28 sps:$4 sm:$0xff]  }
 0x7d2   :  { %2618 = vmatprep.subr.bf16.mxu0 %v3623_v20  ;;  %v3712_v20 = vld [vmem:[%s4589_s3 + $0xf4] ss:$28 sps:$4 sm:$0xff]  }
 0x7d5   :  { %2619 = vmatpush1.bf16.msra.mxu0 %v3621_v21  ;;  %v3713_v21 = vld [vmem:[%s4589_s3 + $0x2b8] ss:$28 sps:$4 sm:$0xff]  }
 0x7d6   :  { %2620 = vmatprep.subr.bf16.mxu0 %v3629_v22  ;;  %v3710_v22 = vld [vmem:[%s4589_s3 + $0xf0] ss:$28 sps:$4 sm:$0xff]  }
 0x7d9   :  { %2621 = vmatpush1.bf16.msra.mxu0 %v3627_v23  ;;  %v3714_v23 = vld [vmem:[%s4589_s3 + $0xf8] ss:$28 sps:$4 sm:$0xff]  }
 0x7da   :  { %2622 = vmatprep.subr.bf16.mxu0 %v3635_v24  ;;  %v3717_v24 = vld [vmem:[%s4589_s3 + $0x12c] ss:$28 sps:$4 sm:$0xff]  }
 0x7dd   :  { %2623 = vmatpush1.bf16.msra.mxu0 %v3633_v25  ;;  %v3718_v25 = vld [vmem:[%s4589_s3 + $0x2f0] ss:$28 sps:$4 sm:$0xff]  }
 0x7de   :  { %2624 = vmatprep.subr.bf16.mxu0 %v3641_v26  ;;  %v3715_v26 = vld [vmem:[%s4589_s3 + $0x128] ss:$28 sps:$4 sm:$0xff]  }
 0x7e1   :  { %2625 = vmatpush1.bf16.msra.mxu0 %v3639_v27  ;;  %v3719_v27 = vld [vmem:[%s4589_s3 + $0x130] ss:$28 sps:$4 sm:$0xff]  }
 0x7e2   :  { %2626 = vmatprep.subr.bf16.mxu0 %v3647_v28  ;;  %v3722_v28 = vld [vmem:[%s4589_s3 + $0x164] ss:$28 sps:$4 sm:$0xff]  }
 0x7e5   :  { %2627 = vmatpush1.bf16.msra.mxu0 %v3645_v29  ;;  %v3723_v29 = vld [vmem:[%s4589_s3 + $0x328] ss:$28 sps:$4 sm:$0xff]  }
 0x7e6   :  { %2628 = vmatprep.subr.bf16.mxu0 %v3653_v30  ;;  %v3720_v30 = vld [vmem:[%s4589_s3 + $0x160] ss:$28 sps:$4 sm:$0xff]  }
 0x7e9   :  { %2629 = vmatpush1.bf16.msra.mxu0 %v3651_v31  ;;  %v3724_v31 = vld [vmem:[%s4589_s3 + $0x168] ss:$28 sps:$4 sm:$0xff]  }
 0x7ea   :  { %2630 = vmatprep.subr.bf16.mxu0 %v3659_v32  ;;  %v3727_v32 = vld [vmem:[%s4589_s3 + $0x19c] ss:$28 sps:$4 sm:$0xff]  }
 0x7ed   :  { %2631 = vmatpush1.bf16.msra.mxu0 %v3657_v33  ;;  %v3728_v33 = vld [vmem:[%s4589_s3 + $0x360] ss:$28 sps:$4 sm:$0xff]  }
 0x7ee   :  { %2632 = vmatprep.subr.bf16.mxu0 %v3665_v34  ;;  %v3725_v34 = vld [vmem:[%s4589_s3 + $0x198] ss:$28 sps:$4 sm:$0xff]  }
 0x7f1   :  { %2633 = vmatpush1.bf16.msra.mxu0 %v3663_v35  ;;  %v3729_v35 = vld [vmem:[%s4589_s3 + $0x1a0] ss:$28 sps:$4 sm:$0xff]  }
 0x7f2   :  { %2634 = vmatprep.subr.bf16.mxu0 %v3671_v36  ;;  %v3732_v36 = vld [vmem:[%s4589_s3 + $0x1d4] ss:$28 sps:$4 sm:$0xff]  }
 0x7f5   :  { %2635 = vmatpush1.bf16.msra.mxu0 %v3669_v37  ;;  %v3730_v37 = vld [vmem:[%s4589_s3 + $0x1d0] ss:$28 sps:$4 sm:$0xff]  }
 0x7f6   :  { %2636 = vmatprep.subr.bf16.mxu0 %v3677_v38  ;;  %v3735_v38 = vld [vmem:[%s4589_s3 + $0x20c] ss:$28 sps:$4 sm:$0xff]  }
 0x7f9   :  { %2637 = vmatpush1.bf16.msra.mxu0 %v3675_v39  ;;  %v3733_v39 = vld [vmem:[%s4589_s3 + $0x208] ss:$28 sps:$4 sm:$0xff]  }
 0x7fa   :  { %2638 = vmatprep.subr.bf16.mxu0 %v3683_v41  ;;  %v3736_v41 = vld [vmem:[%s4589_s3 + $0x240] ss:$28 sps:$4 sm:$0xff]  }
 0x7fd   :  { %2639 = vmatpush1.bf16.msra.mxu0 %v3681_v43  ;;  %v3739_v43 = vld [vmem:[%s4589_s3 + $0x278] ss:$28 sps:$4 sm:$0xff]  }
 0x7fe   :  { %2640 = vmatprep.subr.bf16.mxu0 %v3689_v45  ;;  %v3742_v45 = vld [vmem:[%s4589_s3 + $0x2b0] ss:$28 sps:$4 sm:$0xff]  }
 0x801   :  { %2641 = vmatpush1.bf16.msra.mxu0 %v3687_v47  ;;  %v3745_v47 = vld [vmem:[%s4589_s3 + $0x2e8] ss:$28 sps:$4 sm:$0xff]  }
 0x802   :  { %3195 = vmatprep.subr.bf16.mxu0 %v3693_v49  ;;  %v3748_v49 = vld [vmem:[%s4589_s3 + $0x320] ss:$28 sps:$4 sm:$0xff]  }
 0x897   :  { %v1808_v53 = vpop.f32.mrb[4].mxu0 }
 0x898   :  { %v1809_v54 = vadd.f32 %v1808_v53, %v1687_v51  ;;  %v1810_v55 = vpop.f32.mrb[5].mxu0  ;;  %v2990_v53 = vld [vmem:[%s4590_s4 + $0x39] ss:$8 sm:$0x70] }
 0x899   :  { %v1811_v56 = vadd.f32 %v1810_v55, %v1691_v52  ;;  %v1812_v57 = vpop.f32.mrb[6].mxu0  ;;  %v1966_v55 = vsub.s32 2, %v3917_v10 }
 0x89a   :  { %v1813_v58 = vadd.f32 %v1812_v57, %v1687_v51  ;;  %v1814_v59 = vpop.f32.mrb[7].mxu0  ;;  %v1817_v61 = vmax.f32 %v1809_v54, 0.0  ;;  %v3751_v51 = vld [vmem:[%s4589_s3 + $0x358] ss:$28 sps:$4 sm:$0xff]  }
 0x89b   :  { %v1815_v60 = vadd.f32 %v1814_v59, %v1691_v52  ;;  %v1818_v63 = vmax.f32 %v1811_v56, 0.0  ;;  %v2989_v52 = vld [vmem:[%s4590_s4 + $0x39] ss:$8 sm:$0xf]  ;;  %v1970_v56 = vsub.s32 3, %v3917_v10 }
 0x89c   :  { %v1819_v62 = vmax.f32 %v1813_v58, 0.0  ;;  %v1954_v54 = vor.u32 %v2990_v53, %v2989_v52 }
 0x89d   :  { %v1820_v0 = vmax.f32 %v1815_v60, 0.0 }
 0x89e   :  { %v4405_v1 = vpack.c.bf16 %v1819_v62, %v1817_v61  ;;  %v1959_v57 = vrot.slane %v1954_v54, %v3920_v11  ;;  %v1967_v58 = vrot.slane %v1954_v54, %v1966_v55  ;;  %v1963_v59 = vrot.slane %v1954_v54, %v3926_v13 }
 0x89f   :  { %v1822_v2 = vpack.c.bf16 %v1820_v0, %v1818_v63  ;;  %v1971_v60 = vrot.slane %v1954_v54, %v1970_v56 }
 0x8a1   :  { %2599 = vmatprep.mubr.bf16.mxu1 %v1822_v2  ;;  %2642 = vmatprep.mubr.bf16.mxu0 %v1822_v2 }
 0x8a2   :  { %2600 = vmatmul.mubr.bf16.vlgmr.msra.gmra.mrb[28].mxu1 %v4405_v1  ;;  %2643 = vmatmul.mubr.bf16.vlgmr.msra.gmra.mrb[8].mxu0 %v4405_v1 }
 0x8a3   :  { %2654 = vmatpush1.bf16.msra.mxu1 %v3690_v3  ;;  %3196 = vmatpush3.bf16.msra.mxu0 %v3694_v4 }
 0x8a4   :  { %2685 = vmatprep.mubr.bf16.mxu1 %v1822_v2  ;;  %2728 = vmatprep.mubr.bf16.mxu0 %v1822_v2 }
 0x8a5   :  { %2655 = vmatprep.subr.bf16.mxu1 %v3697_v5  ;;  %3197 = vmatprep.subr.bf16.mxu0 %v3698_v6 }
 0x8a7   :  { %2656 = vmatpush1.bf16.msra.mxu1 %v3695_v7  ;;  %3198 = vmatpush3.bf16.msra.mxu0 %v3699_v9 }
 0x8a8   :  { %2657 = vmatprep.subr.bf16.mxu1 %v3702_v8  ;;  %3199 = vmatprep.subr.bf16.mxu0 %v3703_v12 }
 0x8ab   :  { %2658 = vmatpush1.bf16.msra.mxu1 %v3700_v14  ;;  %3200 = vmatpush3.bf16.msra.mxu0 %v3704_v15 }
 0x8ac   :  { %2659 = vmatprep.subr.bf16.mxu1 %v3707_v16  ;;  %3201 = vmatprep.subr.bf16.mxu0 %v3708_v17 }
 0x8af   :  { %2660 = vmatpush1.bf16.msra.mxu1 %v3705_v18  ;;  %3202 = vmatpush3.bf16.msra.mxu0 %v3709_v19 }
 0x8b0   :  { %2661 = vmatprep.subr.bf16.mxu1 %v3712_v20  ;;  %3203 = vmatprep.subr.bf16.mxu0 %v3713_v21 }
 0x8b3   :  { %2662 = vmatpush1.bf16.msra.mxu1 %v3710_v22  ;;  %3204 = vmatpush3.bf16.msra.mxu0 %v3714_v23 }
 0x8b4   :  { %2663 = vmatprep.subr.bf16.mxu1 %v3717_v24  ;;  %3205 = vmatprep.subr.bf16.mxu0 %v3718_v25 }
 0x8b7   :  { %2664 = vmatpush1.bf16.msra.mxu1 %v3715_v26  ;;  %3206 = vmatpush3.bf16.msra.mxu0 %v3719_v27  ;;  %v1982_v26 = vsub.s32 6, %v3917_v10 }
 0x8b8   :  { %2665 = vmatprep.subr.bf16.mxu1 %v3722_v28  ;;  %3207 = vmatprep.subr.bf16.mxu0 %v3723_v29 }
 0x8b9   :  { %v1983_v28 = vrot.slane %v1954_v54, %v1982_v26 }
 0x8bb   :  { %2666 = vmatpush1.bf16.msra.mxu1 %v3720_v30  ;;  %3208 = vmatpush3.bf16.msra.mxu0 %v3724_v31 }
 0x8bc   :  { %2667 = vmatprep.subr.bf16.mxu1 %v3727_v32  ;;  %3209 = vmatprep.subr.bf16.mxu0 %v3728_v33 }
 0x8bf   :  { %2668 = vmatpush1.bf16.msra.mxu1 %v3725_v34  ;;  %3210 = vmatpush3.bf16.msra.mxu0 %v3729_v35 }
 0x8c0   :  { %2669 = vmatprep.subr.bf16.mxu1 %v3732_v36 }
 0x8c2   :  { %2729 = vmatmul.mubr.bf16.vlgmr.msra.gmra.mrb[12].mxu0 %v4405_v1 }
 0x8c3   :  { %2670 = vmatpush1.bf16.msra.mxu1 %v3730_v37 }
 0x8c4   :  { %2671 = vmatprep.subr.bf16.mxu1 %v3735_v38 }
 0x8c7   :  { %2672 = vmatpush1.bf16.msra.mxu1 %v3733_v39 }
 0x8c8   :  { %2673 = vmatprep.subr.bf16.mxu1 %v3738_v40  ;;  %v1974_v40 = vsub.s32 4, %v3917_v10 }
 0x8cb   :  { %2674 = vmatpush1.bf16.msra.mxu1 %v3736_v41  ;;  %v1978_v41 = vsub.s32 5, %v3917_v10 }
 0x8cc   :  { %2675 = vmatprep.subr.bf16.mxu1 %v3741_v42  ;;  %v1975_v42 = vrot.slane %v1954_v54, %v1974_v40 }
 0x8cf   :  { %2676 = vmatpush1.bf16.msra.mxu1 %v3739_v43  ;;  %v1979_v43 = vrot.slane %v1954_v54, %v1978_v41 }
 0x8d0   :  { %2677 = vmatprep.subr.bf16.mxu1 %v3744_v44 }
 0x8d3   :  { %2678 = vmatpush1.bf16.msra.mxu1 %v3742_v45 }
 0x8d4   :  { %2679 = vmatprep.subr.bf16.mxu1 %v3747_v46 }
 0x8d7   :  { %2680 = vmatpush1.bf16.msra.mxu1 %v3745_v47 }
 0x8d8   :  { %2681 = vmatprep.subr.bf16.mxu1 %v3750_v48 }
 0x8db   :  { %2682 = vmatpush1.bf16.msra.mxu1 %v3748_v49 }
 0x8dc   :  { %2683 = vmatprep.subr.bf16.mxu1 %v3753_v50 }
 0x8df   :  { %2684 = vmatpush1.bf16.msra.mxu1 %v3751_v51 }
 0x8e2   :  { %2686 = vmatmul.mubr.bf16.vlgmr.msra.gmra.mrb[32].mxu1 %v4405_v1 }
 0x975   :  { %v2601_v61 = vpop.f32.mrb[28].mxu1  ;;  %v2644_v62 = vpop.f32.mrb[8].mxu0 }
 0x976   :  { %v2602_v63 = vadd.f32 %v2601_v61, %v1959_v57  ;;  %v2645_v0 = vadd.f32 %v2644_v62, %v1967_v58  ;;  %v2603_v1 = vpop.f32.mrb[29].mxu1  ;;  %v2646_v2 = vpop.f32.mrb[9].mxu0 }
 0x977   :  { %v2604_v3 = vadd.f32 %v2603_v1, %v1963_v59  ;;  %v2647_v4 = vadd.f32 %v2646_v2, %v1971_v60  ;;  %v2605_v5 = vpop.f32.mrb[30].mxu1  ;;  %v2648_v6 = vpop.f32.mrb[10].mxu0 }
 0x978   :  { %v2737_v7 = vmax.f32 %v2602_v63, 0.0  ;;  %v2739_v9 = vmax.f32 %v2645_v0, 0.0  ;;  %v2606_v8 = vadd.f32 %v2605_v5, %v1959_v57  ;;  %v2649_v12 = vadd.f32 %v2648_v6, %v1967_v58  ;;  %v2607_v14 = vpop.f32.mrb[31].mxu1  ;;  %v2650_v11 = vpop.f32.mrb[11].mxu0 }
 0x979   :  { %v2738_v15 = vmax.f32 %v2604_v3, 0.0  ;;  %v2740_v16 = vmax.f32 %v2647_v4, 0.0  ;;  %v2608_v13 = vadd.f32 %v2607_v14, %v1963_v59  ;;  %v2651_v17 = vadd.f32 %v2650_v11, %v1971_v60 }
 0x97a   :  { %v2744_v18 = vmax.f32 %v2606_v8, 0.0  ;;  %v2746_v19 = vmax.f32 %v2649_v12, 0.0 }
 0x97b   :  { %v3111_v20 = vpack.c.bf16 %v2738_v15, %v2737_v7  ;;  %v3112_v21 = vpack.c.bf16 %v2740_v16, %v2739_v9  ;;  %v2745_v22 = vmax.f32 %v2608_v13, 0.0  ;;  %v2747_v23 = vmax.f32 %v2651_v17, 0.0 }
 0x97d   :  { %2795 = vst [vmem:[%s4591_s5] sm:$0xff] %v3111_v20  ;;  %2796 = vst [vmem:[%s4591_s5 + $0x8] sm:$0xff] %v3112_v21  ;;  %v3115_v24 = vpack.c.bf16 %v2745_v22, %v2744_v18  ;;  %v3116_v25 = vpack.c.bf16 %v2747_v23, %v2746_v19 }
 0x97f   :  { %2800 = vst [vmem:[%s4591_s5 + $0x1c] sm:$0xff] %v3115_v24  ;;  %2801 = vst [vmem:[%s4591_s5 + $0x24] sm:$0xff] %v3116_v25 }
 0x995   :  { %v3211_v27 = vpop.f32.mrb[12].mxu0 }
 0x996   :  { %v3212_v29 = vpop.f32.mrb[13].mxu0 }
 0x997   :  { %v3213_v30 = vadd.f32 %v3212_v29, %v3211_v27  ;;  %v3214_v31 = vpop.f32.mrb[14].mxu0 }
 0x998   :  { %v3215_v32 = vpop.f32.mrb[15].mxu0 }
 0x999   :  { %v2731_v33 = vadd.f32 %v3213_v30, %v1983_v28  ;;  %v3216_v34 = vadd.f32 %v3215_v32, %v3214_v31 }
 0x99b   :  { %v2743_v35 = vmax.f32 %v2731_v33, 0.0  ;;  %v2734_v36 = vadd.f32 %v3216_v34, %v1983_v28 }
 0x99d   :  { %v3114_v37 = vpack.c.bf16 %v2743_v35, %v2743_v35  ;;  %v2750_v38 = vmax.f32 %v2734_v36, 0.0 }
 0x99f   :  { %2799 = vst.msk [vmem:[%s4591_s5 + $0x18] sm:$0xf] %vm2798_vm2, %v3114_v37  ;;  %v3118_v39 = vpack.c.bf16 %v2750_v38, %v2750_v38 }
 0x9a1   :  { %2803 = vst.msk [vmem:[%s4591_s5 + $0x34] sm:$0xf] %vm2798_vm2, %v3118_v39 }
 0x9b5   :  { %v2687_v44 = vpop.f32.mrb[32].mxu1 }
 0x9b6   :  { %v2688_v45 = vadd.f32 %v2687_v44, %v1975_v42  ;;  %v2689_v46 = vpop.f32.mrb[33].mxu1 }
 0x9b7   :  { %v2690_v47 = vadd.f32 %v2689_v46, %v1979_v43  ;;  %v2691_v48 = vpop.f32.mrb[34].mxu1 }
 0x9b8   :  { %v2741_v49 = vmax.f32 %v2688_v45, 0.0  ;;  %v2692_v50 = vadd.f32 %v2691_v48, %v1975_v42  ;;  %v2693_v51 = vpop.f32.mrb[35].mxu1 }
 0x9b9   :  { %v2742_v52 = vmax.f32 %v2690_v47, 0.0  ;;  %v2694_v53 = vadd.f32 %v2693_v51, %v1979_v43 }
 0x9ba   :  { %v2748_v55 = vmax.f32 %v2692_v50, 0.0 }
 0x9bb   :  { %v3113_v56 = vpack.c.bf16 %v2742_v52, %v2741_v49  ;;  %v2749_v57 = vmax.f32 %v2694_v53, 0.0 }
 0x9bd   :  { %2797 = vst [vmem:[%s4591_s5 + $0x10] sm:$0xff] %v3113_v56  ;;  %v3117_v10 = vpack.c.bf16 %v2749_v57, %v2748_v55 }
 0x9bf   :  { %2802 = vst [vmem:[%s4591_s5 + $0x2c] sm:$0xff] %v3117_v10 }
 0x9c0   :  { %2808 = vsyncpa [#allocation3], 1 }

</bundles_post_ra>
